<compile_context>
chip_gen: v6e
topology: v6e:2x2x1
jax: 0.10.0
libtpu: 0.0.40
codegen_flags: <defaults>
</compile_context>

<pallas_src>
import numpy as np
import jax
import jax.numpy as jnp
from jax.experimental import pallas as pl
from jax.experimental.pallas import tpu as pltpu

HID_PAD = 128  # each GRU gate padded to one full 128-lane vreg


# ----------------------------------------------------------------------------
# Host-side parameter packing: one contiguous (R, width) f32 buffer,
# 8-row aligned per param, sliced with static offsets inside the kernel.
# ----------------------------------------------------------------------------
def _pack_params(named_arrays, width):
    blocks, meta, off = [], {}, 0
    for name, arr in named_arrays:
        a = np.asarray(arr, dtype=np.float32)
        if a.ndim == 1:
            a = a[None, :]
        r, c = a.shape
        rp = -(-r // 8) * 8  # round rows up to a sublane multiple
        buf = np.zeros((rp, width), np.float32)
        buf[:r, :c] = a
        blocks.append(buf)
        meta[name] = (off, r, c)
        off += rp
    return jnp.asarray(np.concatenate(blocks, axis=0)), meta


# ----------------------------------------------------------------------------
# Fused Pallas kernel: all pred_len steps for one batch element.
# ----------------------------------------------------------------------------
def _make_fused_kernel(meta, pred_len, N, Din, E, e_h, e_out, gnn_out, HP):
    def kernel(x_ref, feat_ref, s2_ref, sdt_ref, ewb_ref, w_ref, out_ref):
        f32 = jnp.float32

        def getp(name):
            off, r, c = meta[name]
            return w_ref[off:off + r, :c]

        def mm(a, b):
            return jnp.dot(a, b, preferred_element_type=f32)

        x0 = x_ref[0]          # (N, Din)   node_vec for this batch element
        s2 = s2_ref[...]       # (E, 2N)    [one_hot(src) | one_hot(tgt)]
        sdt = sdt_ref[...]     # (N, E)     (one_hot(tgt) - one_hot(src))^T
        ewb = ewb_ref[...]     # (E, e_h)   ew * w1e + b1 (host-folded)

        # weights (all reads hoisted above the prediction loop)
        w1s, w1t = getp("w1s"), getp("w1t")      # (Din, e_h)
        w2, wn = getp("w2"), getp("wn")          # (e_h, e_out), (e_out, gnn_out)
        wih_g = getp("wih_g")                    # (gnn_out, 3*HP)
        wih_x = getp("wih_x")                    # (Din,     3*HP)
        whh = getp("whh")                        # (HP,      3*HP)
        wout = getp("wout")                      # (HP, 1)

        # bias broadcasts hoisted once (no per-step broadcast_in_dim)
        b2 = jnp.broadcast_to(getp("b2"), (E, e_out))
        bn = jnp.broadcast_to(getp("bn"), (N, gnn_out))
        bih = jnp.broadcast_to(getp("bih"), (N, 3 * HP))   # r,z: bih+bhh; n: bih
        bhh = jnp.broadcast_to(getp("bhh"), (N, 3 * HP))   # only n slot nonzero
        bout = jnp.broadcast_to(getp("bout"), (N, 1))

        h = jnp.zeros((N, HP), f32)  # lane-padded hidden state (pad lanes stay 0)
        x = x0
        xn = None
        preds = []
        # pred_len is small & static -> trace-time unroll keeps hn/xn on-chip.
        for i in range(pred_len):
            if i > 0:
                # x = cat([xn, feature]) — one tiny lane concat per step.
                x = jnp.concatenate([xn, feat_ref[0, i - 1]], axis=-1)

            # --- GraphGNN edge MLP: fused one-hot gather matmul
            xs = mm(x, w1s)                                   # (N, e_h)
            xt = mm(x, w1t)                                   # (N, e_h)
            xst = jnp.concatenate([xs, xt], axis=0)           # (2N, e_h)
            h1 = jax.nn.sigmoid(mm(s2, xst) + ewb)            # (E, e_h)
            eo = jax.nn.sigmoid(mm(h1, w2) + b2)              # (E, e_out)
            # scatter_add(tgt) - scatter_add(src) == sdiff^T @ eo (pre-transposed)
            agg = mm(sdt, eo)                                  # (N, e_out)
            g = jax.nn.sigmoid(mm(agg, wn) + bn)               # (N, gnn_out)

            # --- GRU cell on cat([g, x]): 3 fused matmuls, 128-aligned gates
            gi = mm(g, wih_g) + mm(x, wih_x) + bih             # (N, 3*HP)
            gh = mm(h, whh) + bhh                              # (N, 3*HP)
            r = jax.nn.sigmoid(gi[:, 0:HP] + gh[:, 0:HP])
            z = jax.nn.sigmoid(gi[:, HP:2 * HP] + gh[:, HP:2 * HP])
            n = jnp.tanh(gi[:, 2 * HP:3 * HP] + r * gh[:, 2 * HP:3 * HP])
            h = (1.0 - z) * n + z * h                          # (N, HP)

            # --- fc_out
            xn = mm(h, wout) + bout                            # (N, 1)
            preds.append(xn)

        # single lane-packed store for all steps
        out = preds[0] if pred_len == 1 else jnp.concatenate(preds, axis=-1)
        out_ref[0] = out                                       # (N, pred_len)

    return kernel


# ----------------------------------------------------------------------------
# Wrapper: host-side edge / weight preprocessing + one pallas_call.
# ----------------------------------------------------------------------------
def ls_gnn_forward(node_vec, feature, edge_src, edge_tgt, edge_w, params,
                   hist_len, pred_len):
    B, N, Din = node_vec.shape
    H = params["whh"].shape[0]
    HP = HID_PAD
    e_h = params["w1s"].shape[1]
    e_out = params["w2"].shape[1]
    gnn_out = params["wn"].shape[1]

    # dense_to_sparse done by caller; guard E == 0 with a no-op self edge
    E = int(edge_src.shape[0])
    if E == 0:
        edge_src = jnp.zeros((1,), jnp.int32)
        edge_tgt = jnp.zeros((1,), jnp.int32)
        edge_w = jnp.zeros((1,), jnp.float32)
        E = 1

    s_src = jax.nn.one_hot(edge_src, N, dtype=jnp.float32)      # (E, N)
    s_tgt = jax.nn.one_hot(edge_tgt, N, dtype=jnp.float32)      # (E, N)
    s2 = jnp.concatenate([s_src, s_tgt], axis=1)                # (E, 2N)
    sdt = jnp.transpose(s_tgt - s_src)                          # (N, E)
    # per-edge constant part of edge-MLP layer 1: ew * w1e + b1
    ewb = edge_w[:, None] * params["w1e"] + params["b1"]        # (E, e_h)

    # pad edge dim to a sublane multiple (zero one-hot rows contribute nothing)
    Ep = -(-E // 8) * 8
    if Ep != E:
        s2 = jnp.pad(s2, ((0, Ep - E), (0, 0)))
        sdt = jnp.pad(sdt, ((0, 0), (0, Ep - E)))
        ewb = jnp.pad(ewb, ((0, Ep - E), (0, 0)))

    # only ship the feature frames actually read: hist_len+1 .. hist_len+pred_len-1
    if pred_len > 1:
        feat_used = feature[:, hist_len + 1: hist_len + pred_len]
    else:
        feat_used = jnp.zeros((B, 1, N, Din - 1), feature.dtype)
    F = feat_used.shape[1]

    # ---- GRU weight packing: each gate padded to 128 lanes (free vreg slices)
    def gate_pad(w):
        w = np.asarray(w, np.float32)
        out = np.zeros((w.shape[0], 3 * HP), np.float32)
        for k in range(3):
            out[:, k * HP:k * HP + H] = w[:, k * H:(k + 1) * H]
        return out

    wih_g = gate_pad(params["wih_g"])                            # (gnn_out, 3HP)
    wih_x = gate_pad(params["wih_x"])                            # (Din, 3HP)
    whh = np.zeros((HP, 3 * HP), np.float32)
    whh[:H] = gate_pad(params["whh"])                            # (HP, 3HP)
    bih_np = np.asarray(params["bih"], np.float32).reshape(3 * H)
    bhh_np = np.asarray(params["bhh"], np.float32).reshape(3 * H)
    bih_fold = np.zeros((1, 3 * HP), np.float32)
    bhh_n = np.zeros((1, 3 * HP), np.float32)
    for k in range(3):
        if k < 2:  # r, z gates: bih + bhh folds into one bias
            bih_fold[0, k * HP:k * HP + H] = (bih_np[k * H:(k + 1) * H]
                                              + bhh_np[k * H:(k + 1) * H])
        else:      # n gate: bhh_n stays separate (scaled by r)
            bih_fold[0, k * HP:k * HP + H] = bih_np[k * H:(k + 1) * H]
            bhh_n[0, k * HP:k * HP + H] = bhh_np[k * H:(k + 1) * H]
    wout_pad = np.zeros((HP, 1), np.float32)
    wout_pad[:H] = np.asarray(params["wout"], np.float32)

    named = [("w1s", params["w1s"]), ("w1t", params["w1t"]),
             ("w2", params["w2"]), ("b2", params["b2"]),
             ("wn", params["wn"]), ("bn", params["bn"]),
             ("wih_g", wih_g), ("wih_x", wih_x), ("whh", whh),
             ("bih", bih_fold), ("bhh", bhh_n),
             ("wout", wout_pad), ("bout", params["bout"])]
    wpack, meta = _pack_params(named, width=3 * HP)

    kernel = _make_fused_kernel(meta, pred_len, N, Din, Ep, e_h, e_out,
                                gnn_out, HP)

    in_specs = [
        pl.BlockSpec((1, N, Din), lambda b: (b, 0, 0)),
        pl.BlockSpec((1, F, N, Din - 1), lambda b: (b, 0, 0, 0)),
        pl.BlockSpec(s2.shape, lambda b: (0, 0)),
        pl.BlockSpec(sdt.shape, lambda b: (0, 0)),
        pl.BlockSpec(ewb.shape, lambda b: (0, 0)),
        pl.BlockSpec(wpack.shape, lambda b: (0, 0)),
    ]
    out_specs = pl.BlockSpec((1, N, pred_len), lambda b: (b, 0, 0))
    out_shape = jax.ShapeDtypeStruct((B, N, pred_len), jnp.float32)

    pred_nk = pl.pallas_call(
        kernel,
        grid=(B,),
        in_specs=in_specs,
        out_specs=out_specs,
        out_shape=out_shape,
        compiler_params=pltpu.CompilerParams(
            dimension_semantics=("parallel",)),
    )(node_vec, feat_used, s2, sdt, ewb, wpack)

    # (B, N, pred_len) -> (B, pred_len, N, 1) (PyTorch output layout)
    return jnp.transpose(pred_nk, (0, 2, 1))[..., None]


# ----------------------------------------------------------------------------
# Pure-JAX reference (mirrors the PyTorch forward semantics).
# ----------------------------------------------------------------------------
def reference_forward(node_vec, feature, src, tgt, ew, P, hist_len, pred_len):
    B, N, Din = node_vec.shape
    H = P["whh"].shape[0]
    E = src.shape[0]
    E_OUT = P["w2"].shape[1]
    W1 = jnp.concatenate([P["w1s"], P["w1t"], P["w1e"]], axis=0)
    Wih = jnp.concatenate([P["wih_g"], P["wih_x"]], axis=0)

    hn = jnp.zeros((B, N, H), jnp.float32)
    preds = []
    x = node_vec
    xn = None
    for i in range(pred_len):
        if i > 0:
            x = jnp.concatenate([xn, feature[:, hist_len + i]], axis=-1)
        ns = x[:, src]                     # (B, E, Din)
        nt = x[:, tgt]
        ewb = jnp.broadcast_to(ew[None, :, None], (B, E, 1))
        ef = jnp.concatenate([ns, nt, ewb], axis=-1)
        h1 = jax.nn.sigmoid(ef @ W1 + P["b1"])
        eo = jax.nn.sigmoid(h1 @ P["w2"] + P["b2"])
        out_add = jnp.zeros((B, N, E_OUT), jnp.float32).at[:, tgt].add(eo)
        out_sub = jnp.zeros((B, N, E_OUT), jnp.float32).at[:, src].add(-eo)
        g = jax.nn.sigmoid((out_add + out_sub) @ P["wn"] + P["bn"])
        xin = jnp.concatenate([g, x], axis=-1)
        gi = xin @ Wih + P["bih"]
        gh = hn @ P["whh"] + P["bhh"]
        r = jax.nn.sigmoid(gi[..., :H] + gh[..., :H])
        z = jax.nn.sigmoid(gi[..., H:2 * H] + gh[..., H:2 * H])
        n = jnp.tanh(gi[..., 2 * H:] + r * gh[..., 2 * H:])
        hn = (1.0 - z) * n + z * hn
        xn = hn @ P["wout"] + P["bout"]
        preds.append(xn)
    return jnp.stack(preds, axis=1)


# ----------------------------------------------------------------------------
def _linear_init(key, fan_in, fan_out):
    k1, k2 = jax.random.split(key)
    bound = 1.0 / np.sqrt(fan_in)
    W = jax.random.uniform(k1, (fan_in, fan_out), minval=-bound, maxval=bound,
                           dtype=jnp.float32)
    b = jax.random.uniform(k2, (1, fan_out), minval=-bound, maxval=bound,
                           dtype=jnp.float32)
    return W, b


if __name__ == "__main__":
    # small shapes consistent with the module
    B, N, IN_DIM = 2, 8, 4          # batch, stations, in_dim
    HIST_LEN, PRED_LEN = 3, 2
    HID = 64                        # hid_dim
    GNN_OUT, E_H, E_OUT = 13, 32, 30
    FEAT_DIM = IN_DIM - 1           # so cat([xn(1), feature]) has width IN_DIM

    key = jax.random.PRNGKey(0)
    keys = jax.random.split(key, 12)

    node_vec = jax.random.normal(keys[0], (B, N, IN_DIM), dtype=jnp.float32)
    feature = jax.random.normal(keys[1], (B, HIST_LEN + PRED_LEN, N, FEAT_DIM),
                                dtype=jnp.float32)
    # dense adjacency -> sparse edges (host-side dense_to_sparse)
    adj_probs = jax.random.uniform(keys[2], (N, N), dtype=jnp.float32)
    cur_adj = jnp.where(adj_probs > 0.55, adj_probs, 0.0)
    adj_np = np.array(cur_adj)
    src_np, tgt_np = np.nonzero(adj_np)          # row = src, col = target
    ew_np = adj_np[src_np, tgt_np].astype(np.float32)
    edge_src = jnp.asarray(src_np, dtype=jnp.int32)
    edge_tgt = jnp.asarray(tgt_np, dtype=jnp.int32)
    edge_w = jnp.asarray(ew_np)

    # deterministic parameter init (Linear-style uniform)
    W1, b1 = _linear_init(keys[3], 2 * IN_DIM + 1, E_H)
    W2, b2 = _linear_init(keys[4], E_H, E_OUT)
    Wn, bn = _linear_init(keys[5], E_OUT, GNN_OUT)
    Wih, bih = _linear_init(keys[6], GNN_OUT + IN_DIM, 3 * HID)
    Whh, bhh = _linear_init(keys[7], HID, 3 * HID)
    Wout, bout = _linear_init(keys[8], HID, 1)

    params = {
        "w1s": W1[:IN_DIM], "w1t": W1[IN_DIM:2 * IN_DIM],
        "w1e": W1[2 * IN_DIM:2 * IN_DIM + 1], "b1": b1,
        "w2": W2, "b2": b2,
        "wn": Wn, "bn": bn,
        "wih_g": Wih[:GNN_OUT], "wih_x": Wih[GNN_OUT:],
        "whh": Whh, "bih": bih, "bhh": bhh,
        "wout": Wout, "bout": bout,
    }

    out = ls_gnn_forward(node_vec, feature, edge_src, edge_tgt, edge_w, params,
                         HIST_LEN, PRED_LEN)
    out = jax.block_until_ready(out)
    assert out.shape == (B, PRED_LEN, N, 1)

    ref = reference_forward(node_vec, feature, edge_src, edge_tgt, edge_w,
                            params, HIST_LEN, PRED_LEN)
    ref = jax.block_until_ready(ref)
    np.testing.assert_allclose(np.array(out), np.array(ref),
                               rtol=1e-4, atol=1e-4)
    print("KERNEL_OK")
</pallas_src>

<mosaic_0001>
module attributes {stable_mosaic.version = 11 : i64} {
  func.func @kernel(%arg0: i32, %arg1: memref<1x8x4xf32, #tpu.memory_space<vmem>>, %arg2: memref<1x1x8x3xf32, #tpu.memory_space<vmem>>, %arg3: memref<32x16xf32, #tpu.memory_space<vmem>>, %arg4: memref<8x32xf32, #tpu.memory_space<vmem>>, %arg5: memref<32x32xf32, #tpu.memory_space<vmem>>, %arg6: memref<400x384xf32, #tpu.memory_space<vmem>>, %arg7: memref<1x8x2xf32, #tpu.memory_space<vmem>>) attributes {dimension_semantics = [#tpu.dimension_semantics<parallel>], iteration_bounds = array<i64: 2>, scalar_prefetch = 0 : i64, scratch_operands = 0 : i64, tpu.core_type = #tpu.core_type<tc>, window_params = [{transform_indices = @transform_0, window_bounds = array<i64: 1, 8, 4>}, {transform_indices = @transform_1, window_bounds = array<i64: 1, 1, 8, 3>}, {pipeline_mode = #tpu.pipeline_mode<synchronous>, transform_indices = @transform_2, window_bounds = array<i64: 32, 16>}, {pipeline_mode = #tpu.pipeline_mode<synchronous>, transform_indices = @transform_3, window_bounds = array<i64: 8, 32>}, {pipeline_mode = #tpu.pipeline_mode<synchronous>, transform_indices = @transform_4, window_bounds = array<i64: 32, 32>}, {pipeline_mode = #tpu.pipeline_mode<synchronous>, transform_indices = @transform_5, window_bounds = array<i64: 400, 384>}, {transform_indices = @transform_6, window_bounds = array<i64: 1, 8, 2>}]} {
    %c0 = arith.constant 0 : index
    %c0_0 = arith.constant 0 : index
    %c0_1 = arith.constant 0 : index
    %0 = vector.load %arg1[%c0, %c0_0, %c0_1] : memref<1x8x4xf32, #tpu.memory_space<vmem>>, vector<1x8x4xf32>
    %1 = vector.shape_cast %0 : vector<1x8x4xf32> to vector<8x4xf32>
    %c0_2 = arith.constant 0 : index
    %c0_3 = arith.constant 0 : index
    %2 = vector.load %arg3[%c0_2, %c0_3] : memref<32x16xf32, #tpu.memory_space<vmem>>, vector<32x16xf32>
    %c0_4 = arith.constant 0 : index
    %c0_5 = arith.constant 0 : index
    %3 = vector.load %arg4[%c0_4, %c0_5] : memref<8x32xf32, #tpu.memory_space<vmem>>, vector<8x32xf32>
    %c0_6 = arith.constant 0 : index
    %c0_7 = arith.constant 0 : index
    %4 = vector.load %arg5[%c0_6, %c0_7] : memref<32x32xf32, #tpu.memory_space<vmem>>, vector<32x32xf32>
    %c0_8 = arith.constant 0 : index
    %c0_9 = arith.constant 0 : index
    %5 = vector.load %arg6[%c0_8, %c0_9] : memref<400x384xf32, #tpu.memory_space<vmem>>, vector<4x32xf32>
    %c8 = arith.constant 8 : index
    %c0_10 = arith.constant 0 : index
    %6 = vector.load %arg6[%c8, %c0_10] : memref<400x384xf32, #tpu.memory_space<vmem>>, vector<4x32xf32>
    %c16 = arith.constant 16 : index
    %c0_11 = arith.constant 0 : index
    %7 = vector.load %arg6[%c16, %c0_11] : memref<400x384xf32, #tpu.memory_space<vmem>>, vector<32x30xf32>
    %c56 = arith.constant 56 : index
    %c0_12 = arith.constant 0 : index
    %8 = vector.load %arg6[%c56, %c0_12] : memref<400x384xf32, #tpu.memory_space<vmem>>, vector<30x13xf32>
    %c96 = arith.constant 96 : index
    %c0_13 = arith.constant 0 : index
    %9 = vector.load %arg6[%c96, %c0_13] : memref<400x384xf32, #tpu.memory_space<vmem>>, vector<13x384xf32>
    %c112 = arith.constant 112 : index
    %c0_14 = arith.constant 0 : index
    %10 = vector.load %arg6[%c112, %c0_14] : memref<400x384xf32, #tpu.memory_space<vmem>>, vector<4x384xf32>
    %c120 = arith.constant 120 : index
    %c0_15 = arith.constant 0 : index
    %11 = vector.load %arg6[%c120, %c0_15] : memref<400x384xf32, #tpu.memory_space<vmem>>, vector<128x384xf32>
    %c264 = arith.constant 264 : index
    %c0_16 = arith.constant 0 : index
    %12 = vector.load %arg6[%c264, %c0_16] : memref<400x384xf32, #tpu.memory_space<vmem>>, vector<128x1xf32>
    %c48 = arith.constant 48 : index
    %c0_17 = arith.constant 0 : index
    %13 = vector.load %arg6[%c48, %c0_17] : memref<400x384xf32, #tpu.memory_space<vmem>>, vector<1x30xf32>
    %14 = vector.shape_cast %13 : vector<1x30xf32> to vector<1x30xf32>
    %15 = vector.broadcast %14 : vector<1x30xf32> to vector<32x30xf32>
    %c88 = arith.constant 88 : index
    %c0_18 = arith.constant 0 : index
    %16 = vector.load %arg6[%c88, %c0_18] : memref<400x384xf32, #tpu.memory_space<vmem>>, vector<1x13xf32>
    %17 = vector.shape_cast %16 : vector<1x13xf32> to vector<1x13xf32>
    %18 = vector.broadcast %17 : vector<1x13xf32> to vector<8x13xf32>
    %c248 = arith.constant 248 : index
    %c0_19 = arith.constant 0 : index
    %19 = vector.load %arg6[%c248, %c0_19] : memref<400x384xf32, #tpu.memory_space<vmem>>, vector<1x384xf32>
    %20 = vector.shape_cast %19 : vector<1x384xf32> to vector<1x384xf32>
    %21 = vector.broadcast %20 : vector<1x384xf32> to vector<8x384xf32>
    %c256 = arith.constant 256 : index
    %c0_20 = arith.constant 0 : index
    %22 = vector.load %arg6[%c256, %c0_20] : memref<400x384xf32, #tpu.memory_space<vmem>>, vector<1x384xf32>
    %23 = vector.shape_cast %22 : vector<1x384xf32> to vector<1x384xf32>
    %24 = vector.broadcast %23 : vector<1x384xf32> to vector<8x384xf32>
    %c392 = arith.constant 392 : index
    %c0_21 = arith.constant 0 : index
    %25 = vector.load %arg6[%c392, %c0_21] : memref<400x384xf32, #tpu.memory_space<vmem>>, vector<1x1xf32>
    %26 = vector.shape_cast %25 : vector<1x1xf32> to vector<1x1xf32>
    %27 = vector.broadcast %26 : vector<1x1xf32> to vector<8x1xf32>
    %cst = arith.constant 0.000000e+00 : f32
    %28 = vector.broadcast %cst : f32 to vector<8x128xf32>
    %cst_22 = arith.constant dense<0.000000e+00> : vector<8x32xf32>
    %29 = tpu.matmul %1, %5, %cst_22 {dimension_numbers = #tpu.dot_dimension_numbers<[1], [0], [0], [1], [0, 0, 1, 1], [], []>} : vector<8x4xf32>, vector<4x32xf32>, vector<8x32xf32> -> vector<8x32xf32>
    %cst_23 = arith.constant dense<0.000000e+00> : vector<8x32xf32>
    %30 = tpu.matmul %1, %6, %cst_23 {dimension_numbers = #tpu.dot_dimension_numbers<[1], [0], [0], [1], [0, 0, 1, 1], [], []>} : vector<8x4xf32>, vector<4x32xf32>, vector<8x32xf32> -> vector<8x32xf32>
    %31 = tpu.concatenate %29, %30 in 0 : vector<8x32xf32>, vector<8x32xf32> -> vector<16x32xf32>
    %cst_24 = arith.constant dense<0.000000e+00> : vector<32x32xf32>
    %32 = tpu.matmul %2, %31, %cst_24 {dimension_numbers = #tpu.dot_dimension_numbers<[1], [0], [0], [1], [0, 0, 1, 1], [], []>} : vector<32x16xf32>, vector<16x32xf32>, vector<32x32xf32> -> vector<32x32xf32>
    %33 = arith.addf %32, %4 : vector<32x32xf32>
    %34 = arith.negf %33 : vector<32x32xf32>
    %35 = math.exp %34 : vector<32x32xf32>
    %cst_25 = arith.constant 1.000000e+00 : f32
    %36 = vector.broadcast %cst_25 : f32 to vector<32x32xf32>
    %37 = arith.addf %36, %35 : vector<32x32xf32>
    %38 = arith.divf %36, %37 : vector<32x32xf32>
    %cst_26 = arith.constant dense<0.000000e+00> : vector<32x30xf32>
    %39 = tpu.matmul %38, %7, %cst_26 {dimension_numbers = #tpu.dot_dimension_numbers<[1], [0], [0], [1], [0, 0, 1, 1], [], []>} : vector<32x32xf32>, vector<32x30xf32>, vector<32x30xf32> -> vector<32x30xf32>
    %40 = arith.addf %39, %15 : vector<32x30xf32>
    %41 = arith.negf %40 : vector<32x30xf32>
    %42 = math.exp %41 : vector<32x30xf32>
    %cst_27 = arith.constant 1.000000e+00 : f32
    %43 = vector.broadcast %cst_27 : f32 to vector<32x30xf32>
    %44 = arith.addf %43, %42 : vector<32x30xf32>
    %45 = arith.divf %43, %44 : vector<32x30xf32>
    %cst_28 = arith.constant dense<0.000000e+00> : vector<8x30xf32>
    %46 = tpu.matmul %3, %45, %cst_28 {dimension_numbers = #tpu.dot_dimension_numbers<[1], [0], [0], [1], [0, 0, 1, 1], [], []>} : vector<8x32xf32>, vector<32x30xf32>, vector<8x30xf32> -> vector<8x30xf32>
    %cst_29 = arith.constant dense<0.000000e+00> : vector<8x13xf32>
    %47 = tpu.matmul %46, %8, %cst_29 {dimension_numbers = #tpu.dot_dimension_numbers<[1], [0], [0], [1], [0, 0, 1, 1], [], []>} : vector<8x30xf32>, vector<30x13xf32>, vector<8x13xf32> -> vector<8x13xf32>
    %48 = arith.addf %47, %18 : vector<8x13xf32>
    %49 = arith.negf %48 : vector<8x13xf32>
    %50 = math.exp %49 : vector<8x13xf32>
    %cst_30 = arith.constant 1.000000e+00 : f32
    %51 = vector.broadcast %cst_30 : f32 to vector<8x13xf32>
    %52 = arith.addf %51, %50 : vector<8x13xf32>
    %53 = arith.divf %51, %52 : vector<8x13xf32>
    %cst_31 = arith.constant dense<0.000000e+00> : vector<8x384xf32>
    %54 = tpu.matmul %53, %9, %cst_31 {dimension_numbers = #tpu.dot_dimension_numbers<[1], [0], [0], [1], [0, 0, 1, 1], [], []>} : vector<8x13xf32>, vector<13x384xf32>, vector<8x384xf32> -> vector<8x384xf32>
    %cst_32 = arith.constant dense<0.000000e+00> : vector<8x384xf32>
    %55 = tpu.matmul %1, %10, %cst_32 {dimension_numbers = #tpu.dot_dimension_numbers<[1], [0], [0], [1], [0, 0, 1, 1], [], []>} : vector<8x4xf32>, vector<4x384xf32>, vector<8x384xf32> -> vector<8x384xf32>
    %56 = arith.addf %54, %55 : vector<8x384xf32>
    %57 = arith.addf %56, %21 : vector<8x384xf32>
    %cst_33 = arith.constant dense<0.000000e+00> : vector<8x384xf32>
    %58 = tpu.matmul %28, %11, %cst_33 {dimension_numbers = #tpu.dot_dimension_numbers<[1], [0], [0], [1], [0, 0, 1, 1], [], []>} : vector<8x128xf32>, vector<128x384xf32>, vector<8x384xf32> -> vector<8x384xf32>
    %59 = arith.addf %58, %24 : vector<8x384xf32>
    %60 = vector.extract_strided_slice %57 {offsets = [0, 0], sizes = [8, 128], strides = [1, 1]} : vector<8x384xf32> to vector<8x128xf32>
    %61 = vector.extract_strided_slice %59 {offsets = [0, 0], sizes = [8, 128], strides = [1, 1]} : vector<8x384xf32> to vector<8x128xf32>
    %62 = arith.addf %60, %61 : vector<8x128xf32>
    %63 = arith.negf %62 : vector<8x128xf32>
    %64 = math.exp %63 : vector<8x128xf32>
    %cst_34 = arith.constant 1.000000e+00 : f32
    %65 = vector.broadcast %cst_34 : f32 to vector<8x128xf32>
    %66 = arith.addf %65, %64 : vector<8x128xf32>
    %67 = arith.divf %65, %66 : vector<8x128xf32>
    %68 = vector.extract_strided_slice %57 {offsets = [0, 128], sizes = [8, 128], strides = [1, 1]} : vector<8x384xf32> to vector<8x128xf32>
    %69 = vector.extract_strided_slice %59 {offsets = [0, 128], sizes = [8, 128], strides = [1, 1]} : vector<8x384xf32> to vector<8x128xf32>
    %70 = arith.addf %68, %69 : vector<8x128xf32>
    %71 = arith.negf %70 : vector<8x128xf32>
    %72 = math.exp %71 : vector<8x128xf32>
    %cst_35 = arith.constant 1.000000e+00 : f32
    %73 = vector.broadcast %cst_35 : f32 to vector<8x128xf32>
    %74 = arith.addf %73, %72 : vector<8x128xf32>
    %75 = arith.divf %73, %74 : vector<8x128xf32>
    %76 = vector.extract_strided_slice %57 {offsets = [0, 256], sizes = [8, 128], strides = [1, 1]} : vector<8x384xf32> to vector<8x128xf32>
    %77 = vector.extract_strided_slice %59 {offsets = [0, 256], sizes = [8, 128], strides = [1, 1]} : vector<8x384xf32> to vector<8x128xf32>
    %78 = arith.mulf %67, %77 : vector<8x128xf32>
    %79 = arith.addf %76, %78 : vector<8x128xf32>
    %80 = math.tanh %79 : vector<8x128xf32>
    %cst_36 = arith.constant 1.000000e+00 : f32
    %81 = vector.broadcast %cst_36 : f32 to vector<8x128xf32>
    %82 = arith.subf %81, %75 : vector<8x128xf32>
    %83 = arith.mulf %82, %80 : vector<8x128xf32>
    %84 = arith.mulf %75, %28 : vector<8x128xf32>
    %85 = arith.addf %83, %84 : vector<8x128xf32>
    %cst_37 = arith.constant dense<0.000000e+00> : vector<8x1xf32>
    %86 = tpu.matmul %85, %12, %cst_37 {dimension_numbers = #tpu.dot_dimension_numbers<[1], [0], [0], [1], [0, 0, 1, 1], [], []>} : vector<8x128xf32>, vector<128x1xf32>, vector<8x1xf32> -> vector<8x1xf32>
    %87 = arith.addf %86, %27 : vector<8x1xf32>
    %c0_38 = arith.constant 0 : index
    %c0_39 = arith.constant 0 : index
    %c0_40 = arith.constant 0 : index
    %c0_41 = arith.constant 0 : index
    %88 = vector.load %arg2[%c0_38, %c0_39, %c0_40, %c0_41] : memref<1x1x8x3xf32, #tpu.memory_space<vmem>>, vector<1x1x8x3xf32>
    %89 = vector.shape_cast %88 : vector<1x1x8x3xf32> to vector<8x3xf32>
    %90 = tpu.concatenate %87, %89 in 1 : vector<8x1xf32>, vector<8x3xf32> -> vector<8x4xf32>
    %cst_42 = arith.constant dense<0.000000e+00> : vector<8x32xf32>
    %91 = tpu.matmul %90, %5, %cst_42 {dimension_numbers = #tpu.dot_dimension_numbers<[1], [0], [0], [1], [0, 0, 1, 1], [], []>} : vector<8x4xf32>, vector<4x32xf32>, vector<8x32xf32> -> vector<8x32xf32>
    %cst_43 = arith.constant dense<0.000000e+00> : vector<8x32xf32>
    %92 = tpu.matmul %90, %6, %cst_43 {dimension_numbers = #tpu.dot_dimension_numbers<[1], [0], [0], [1], [0, 0, 1, 1], [], []>} : vector<8x4xf32>, vector<4x32xf32>, vector<8x32xf32> -> vector<8x32xf32>
    %93 = tpu.concatenate %91, %92 in 0 : vector<8x32xf32>, vector<8x32xf32> -> vector<16x32xf32>
    %cst_44 = arith.constant dense<0.000000e+00> : vector<32x32xf32>
    %94 = tpu.matmul %2, %93, %cst_44 {dimension_numbers = #tpu.dot_dimension_numbers<[1], [0], [0], [1], [0, 0, 1, 1], [], []>} : vector<32x16xf32>, vector<16x32xf32>, vector<32x32xf32> -> vector<32x32xf32>
    %95 = arith.addf %94, %4 : vector<32x32xf32>
    %96 = arith.negf %95 : vector<32x32xf32>
    %97 = math.exp %96 : vector<32x32xf32>
    %cst_45 = arith.constant 1.000000e+00 : f32
    %98 = vector.broadcast %cst_45 : f32 to vector<32x32xf32>
    %99 = arith.addf %98, %97 : vector<32x32xf32>
    %100 = arith.divf %98, %99 : vector<32x32xf32>
    %cst_46 = arith.constant dense<0.000000e+00> : vector<32x30xf32>
    %101 = tpu.matmul %100, %7, %cst_46 {dimension_numbers = #tpu.dot_dimension_numbers<[1], [0], [0], [1], [0, 0, 1, 1], [], []>} : vector<32x32xf32>, vector<32x30xf32>, vector<32x30xf32> -> vector<32x30xf32>
    %102 = arith.addf %101, %15 : vector<32x30xf32>
    %103 = arith.negf %102 : vector<32x30xf32>
    %104 = math.exp %103 : vector<32x30xf32>
    %cst_47 = arith.constant 1.000000e+00 : f32
    %105 = vector.broadcast %cst_47 : f32 to vector<32x30xf32>
    %106 = arith.addf %105, %104 : vector<32x30xf32>
    %107 = arith.divf %105, %106 : vector<32x30xf32>
    %cst_48 = arith.constant dense<0.000000e+00> : vector<8x30xf32>
    %108 = tpu.matmul %3, %107, %cst_48 {dimension_numbers = #tpu.dot_dimension_numbers<[1], [0], [0], [1], [0, 0, 1, 1], [], []>} : vector<8x32xf32>, vector<32x30xf32>, vector<8x30xf32> -> vector<8x30xf32>
    %cst_49 = arith.constant dense<0.000000e+00> : vector<8x13xf32>
    %109 = tpu.matmul %108, %8, %cst_49 {dimension_numbers = #tpu.dot_dimension_numbers<[1], [0], [0], [1], [0, 0, 1, 1], [], []>} : vector<8x30xf32>, vector<30x13xf32>, vector<8x13xf32> -> vector<8x13xf32>
    %110 = arith.addf %109, %18 : vector<8x13xf32>
    %111 = arith.negf %110 : vector<8x13xf32>
    %112 = math.exp %111 : vector<8x13xf32>
    %cst_50 = arith.constant 1.000000e+00 : f32
    %113 = vector.broadcast %cst_50 : f32 to vector<8x13xf32>
    %114 = arith.addf %113, %112 : vector<8x13xf32>
    %115 = arith.divf %113, %114 : vector<8x13xf32>
    %cst_51 = arith.constant dense<0.000000e+00> : vector<8x384xf32>
    %116 = tpu.matmul %115, %9, %cst_51 {dimension_numbers = #tpu.dot_dimension_numbers<[1], [0], [0], [1], [0, 0, 1, 1], [], []>} : vector<8x13xf32>, vector<13x384xf32>, vector<8x384xf32> -> vector<8x384xf32>
    %cst_52 = arith.constant dense<0.000000e+00> : vector<8x384xf32>
    %117 = tpu.matmul %90, %10, %cst_52 {dimension_numbers = #tpu.dot_dimension_numbers<[1], [0], [0], [1], [0, 0, 1, 1], [], []>} : vector<8x4xf32>, vector<4x384xf32>, vector<8x384xf32> -> vector<8x384xf32>
    %118 = arith.addf %116, %117 : vector<8x384xf32>
    %119 = arith.addf %118, %21 : vector<8x384xf32>
    %cst_53 = arith.constant dense<0.000000e+00> : vector<8x384xf32>
    %120 = tpu.matmul %85, %11, %cst_53 {dimension_numbers = #tpu.dot_dimension_numbers<[1], [0], [0], [1], [0, 0, 1, 1], [], []>} : vector<8x128xf32>, vector<128x384xf32>, vector<8x384xf32> -> vector<8x384xf32>
    %121 = arith.addf %120, %24 : vector<8x384xf32>
    %122 = vector.extract_strided_slice %119 {offsets = [0, 0], sizes = [8, 128], strides = [1, 1]} : vector<8x384xf32> to vector<8x128xf32>
    %123 = vector.extract_strided_slice %121 {offsets = [0, 0], sizes = [8, 128], strides = [1, 1]} : vector<8x384xf32> to vector<8x128xf32>
    %124 = arith.addf %122, %123 : vector<8x128xf32>
    %125 = arith.negf %124 : vector<8x128xf32>
    %126 = math.exp %125 : vector<8x128xf32>
    %cst_54 = arith.constant 1.000000e+00 : f32
    %127 = vector.broadcast %cst_54 : f32 to vector<8x128xf32>
    %128 = arith.addf %127, %126 : vector<8x128xf32>
    %129 = arith.divf %127, %128 : vector<8x128xf32>
    %130 = vector.extract_strided_slice %119 {offsets = [0, 128], sizes = [8, 128], strides = [1, 1]} : vector<8x384xf32> to vector<8x128xf32>
    %131 = vector.extract_strided_slice %121 {offsets = [0, 128], sizes = [8, 128], strides = [1, 1]} : vector<8x384xf32> to vector<8x128xf32>
    %132 = arith.addf %130, %131 : vector<8x128xf32>
    %133 = arith.negf %132 : vector<8x128xf32>
    %134 = math.exp %133 : vector<8x128xf32>
    %cst_55 = arith.constant 1.000000e+00 : f32
    %135 = vector.broadcast %cst_55 : f32 to vector<8x128xf32>
    %136 = arith.addf %135, %134 : vector<8x128xf32>
    %137 = arith.divf %135, %136 : vector<8x128xf32>
    %138 = vector.extract_strided_slice %119 {offsets = [0, 256], sizes = [8, 128], strides = [1, 1]} : vector<8x384xf32> to vector<8x128xf32>
    %139 = vector.extract_strided_slice %121 {offsets = [0, 256], sizes = [8, 128], strides = [1, 1]} : vector<8x384xf32> to vector<8x128xf32>
    %140 = arith.mulf %129, %139 : vector<8x128xf32>
    %141 = arith.addf %138, %140 : vector<8x128xf32>
    %142 = math.tanh %141 : vector<8x128xf32>
    %cst_56 = arith.constant 1.000000e+00 : f32
    %143 = vector.broadcast %cst_56 : f32 to vector<8x128xf32>
    %144 = arith.subf %143, %137 : vector<8x128xf32>
    %145 = arith.mulf %144, %142 : vector<8x128xf32>
    %146 = arith.mulf %137, %85 : vector<8x128xf32>
    %147 = arith.addf %145, %146 : vector<8x128xf32>
    %cst_57 = arith.constant dense<0.000000e+00> : vector<8x1xf32>
    %148 = tpu.matmul %147, %12, %cst_57 {dimension_numbers = #tpu.dot_dimension_numbers<[1], [0], [0], [1], [0, 0, 1, 1], [], []>} : vector<8x128xf32>, vector<128x1xf32>, vector<8x1xf32> -> vector<8x1xf32>
    %149 = arith.addf %148, %27 : vector<8x1xf32>
    %150 = tpu.concatenate %87, %149 in 1 : vector<8x1xf32>, vector<8x1xf32> -> vector<8x2xf32>
    %c0_58 = arith.constant 0 : index
    %c0_59 = arith.constant 0 : index
    %c0_60 = arith.constant 0 : index
    %151 = vector.load %arg7[%c0_58, %c0_59, %c0_60] : memref<1x8x2xf32, #tpu.memory_space<vmem>>, vector<1x8x2xf32>
    %152 = vector.shape_cast %151 : vector<1x8x2xf32> to vector<8x2xf32>
    %153 = vector.shape_cast %150 : vector<8x2xf32> to vector<1x8x2xf32>
    tpu.vector_store %arg7[%c0_58, %c0_59, %c0_60], %153 {strides = array<i32>} : memref<1x8x2xf32, #tpu.memory_space<vmem>>, vector<1x8x2xf32>,
    return
  }
  func.func @transform_0(%arg0: i32) -> (i32, i32, i32) {
    %c0_i32 = arith.constant 0 : i32
    %c0_i32_0 = arith.constant 0 : i32
    %c0_i32_1 = arith.constant 0 : i32
    return %arg0, %c0_i32, %c0_i32_0 : i32, i32, i32
  }
  func.func @transform_1(%arg0: i32) -> (i32, i32, i32, i32) {
    %c0_i32 = arith.constant 0 : i32
    %c0_i32_0 = arith.constant 0 : i32
    %c0_i32_1 = arith.constant 0 : i32
    %c0_i32_2 = arith.constant 0 : i32
    return %arg0, %c0_i32, %c0_i32_0, %c0_i32_1 : i32, i32, i32, i32
  }
  func.func @transform_2(%arg0: i32) -> (i32, i32) {
    %c0_i32 = arith.constant 0 : i32
    %c0_i32_0 = arith.constant 0 : i32
    %c0_i32_1 = arith.constant 0 : i32
    return %c0_i32, %c0_i32_0 : i32, i32
  }
  func.func @transform_3(%arg0: i32) -> (i32, i32) {
    %c0_i32 = arith.constant 0 : i32
    %c0_i32_0 = arith.constant 0 : i32
    %c0_i32_1 = arith.constant 0 : i32
    return %c0_i32, %c0_i32_0 : i32, i32
  }
  func.func @transform_4(%arg0: i32) -> (i32, i32) {
    %c0_i32 = arith.constant 0 : i32
    %c0_i32_0 = arith.constant 0 : i32
    %c0_i32_1 = arith.constant 0 : i32
    return %c0_i32, %c0_i32_0 : i32, i32
  }
  func.func @transform_5(%arg0: i32) -> (i32, i32) {
    %c0_i32 = arith.constant 0 : i32
    %c0_i32_0 = arith.constant 0 : i32
    %c0_i32_1 = arith.constant 0 : i32
    return %c0_i32, %c0_i32_0 : i32, i32
  }
  func.func @transform_6(%arg0: i32) -> (i32, i32, i32) {
    %c0_i32 = arith.constant 0 : i32
    %c0_i32_0 = arith.constant 0 : i32
    %c0_i32_1 = arith.constant 0 : i32
    return %arg0, %c0_i32, %c0_i32_0 : i32, i32, i32
  }
}

</mosaic_0001>

<bundles_post_ra>
// kernel: tpu_custom_call.1
= control target key start
LH: loop header
LB: loop body
LE: loop exit
PB: predicated region body
PF: predicated region fallthrough
CT: control target
= control target key end

     0   :  { %11 = vsyncpa [#allocation3], 0  ;;  %s3325_s21 = smov 0   ;;  %s4041_s0 = inlined_call_operand.vmem [shape: f32[2,8,4], index: 0, kind: input, shape index: {}]   ;;  %s4042_s1 = inlined_call_operand.vmem [shape: f32[2,1,8,3], index: 1, kind: input, shape index: {}]   ;;  %s4043_s2 = inlined_call_operand.vmem [shape: f32[32,16], index: 2, kind: input, shape index: {}]   ;;  %s4044_s3 = inlined_call_operand.vmem [shape: f32[8,32], index: 3, kind: input, shape index: {}]   ;;  %s4045_s4 = inlined_call_operand.vmem [shape: f32[32,32], index: 4, kind: input, shape index: {}]   ;;  %s4046_s5 = inlined_call_operand.hbm [shape: f32[400,384], index: 5, kind: input, shape index: {}]   ;;  %s4047_s6 = inlined_call_operand.vmem [shape: f32[2,8,2], index: 6, kind: output, shape index: {}]  }
   0x1 LB: > { %s3331_s22 = sadd.s32 4294967295, %s3282_s21   ;;  %p2638_p0 = scmp.ge.s32.totalorder %s3282_s21, 1  ;;  %s3282_s21 = sphi %s3325_s21, %s17_s21  }
   0x2   : > { %p184_p1 = scmp.lt.s32.totalorder %s3282_s21, 3  ;;  %s3284_s23 = smov [#allocation2]  }
   0x3   : > { %s205_s24 = sshll.u32 %s3284_s23, 4  ;;  %p3138_p3 = scmp.eq.s32.totalorder %s3331_s22, 0  ;;  %s206_s24 = int_to_ptr.vmem [resolvable:$true] %s205_s24 }
   0x4   : > { %p3335_p2 = pnand %p2638_p0, %p184_p1  ;;  %s3257_s26 = scalar_lea.vmem %s206_s24, 19200 }
   0x5   : > { %p3258_p7 = scmp.ne.s32.totalorder %s206_s24, %s3257_s26  ;;  %p3265_p10 = scmp.lt.s32.totalorder %s206_s24, %s206_s24 }
   0x6   : > { %p3134_p4 = pneg %p3335_p2  ;;  %p3266_p11 = scmp.lt.s32.totalorder %s3257_s26, %s3257_s26 }
   0x8   : > { %p3135_p5 = pnand %p3138_p3, %p3134_p4  ;;  %p3267_p12 = por %p3266_p11, %p3265_p10 }
   0xa   : > { %p3248_p6 = pneg %p3135_p5 }
   0xc   : > { %p3260_p8 = pnand %p3258_p7, %p3248_p6 }
   0xe   : > { %p3261_p9 = pneg %p3260_p8 }
  0x10   : > { %p3268_p13 = pnand %p3267_p12, %p3261_p9 }
  0x12   : > { %3271 = shalt.err (!%p3268_p13)
}
  0x13   : > { %s3285_s27 = smov 384   ;;  %s3286_s28 = smov 24  }
  0x14   : > { %3137 = dma.hbm_to_vmem [thread:$0]  (!%p3135_p5), %s4046_s5, 19200, %s206_s24, [#allocation3], %s3285_s27, %s3285_s27, %s3286_s28  }
  0x15   : > { %235 = sbr.rel (%p3335_p2) target bundleno = 3282 (0xcd2), region = 44 }
  0x1a   : > { %3277 = dma.done.wait (%p3138_p3), [#allocation3], 19200  }
  0x1b   : > { %3279 = vsyncadd (%p3138_p3), [#allocation3], 4294948096  ;;  %p267_p0 = scmp.lt.s32.totalorder %s3331_s22, 1  ;;  %v4089_v0 = vmov 0.0   ;;  %vm3288_vm0 = vmmov 0   ;;  %vm415_vm1 = vcmask 1043456  }
  0x1c   : > { %2854 = vmatprep.subr.mxu0 %v4089_v0  ;;  %2859 = vmatprep.subr.mxu1 %v4089_v0  ;;  %vm411_vm2 = vcmask 31744   ;;  %v3367_v1 = vld [vmem:[#allocation2] sm:$0xf]  ;;  %v3369_v2 = vld [vmem:[#allocation2 + $0x18] sm:$0xf]  ;;  %vm562_vm3 = vcmask 130048  }
  0x1d   : > { %2856 = vmatprep.mubr.msk.f32.mxu0 %vm3288_vm0, %v4089_v0  ;;  %2861 = vmatprep.mubr.msk.f32.mxu1 %vm3288_vm0, %v4089_v0  ;;  %s4227_s22 = smov (!%p267_p0, %s3331_s22), 1  ;;  %v3384_v4 = vld [vmem:[%s4043_s2] sm:$0xff]  ;;  %v3391_v9 = vld [vmem:[%s4043_s2 + $0x8] sm:$0xff]  ;;  %v3396_v10 = vld [vmem:[%s4043_s2 + $0x10] sm:$0xff]  ;;  %vm684_vm4 = vcmask 261120   ;;  %vm883_vm5 = vcmask 1045504  }
  0x1e   : > { %s3361_s7 = sshll.u32 %s4227_s22, 3  ;;  %2855 = vmatpush3.msk.msra.mxu0 %vm415_vm1, %v3367_v1  ;;  %2860 = vmatpush3.msk.msra.mxu1 %vm415_vm1, %v3369_v2  ;;  %v3406_v11 = vld [vmem:[%s4043_s2 + $0x18] sm:$0xff]  ;;  %v3414_v13 = vld [vmem:[#allocation2 + $0x60] sm:$0xff]  ;;  %v3418_v14 = vld [vmem:[#allocation2 + $0x48] sm:$0xff]  ;;  %vm879_vm6 = vcmask 244736   ;;  %vm1117_vm7 = vcmask 1044480  }
  0x1f   : > { %s270_s10 = scalar_lea.vmem %s4041_s0, %s3361_s7  ;;  %v3412_v12 = vld [vmem:[#allocation2 + $0x78] sm:$0xff]  ;;  %v3422_v15 = vld [vmem:[#allocation2 + $0x30] sm:$0xff]  ;;  %v3432_v16 = vld [vmem:[%s4045_s4 + $0x8] sm:$0xff]  ;;  %vm1113_vm8 = vcmask 105472   ;;  %s274_s9 = scalar_lea.vmem %s4042_s1, %s3361_s7  ;;  %vm1508_vm9 = vcmask 7168   ;;  %vm2557_vm10 = vcmask 15360  }
  0x20   : > { %v3371_v3 = vld [vmem:[%s270_s10] sm:$0xff]  ;;  %2874 = vmatprep.subr.mxu1 %v3412_v12  ;;  %v3443_v21 = vld [vmem:[%s4045_s4 + $0x18] sm:$0xff]  ;;  %v3449_v25 = vld [vmem:[%s4045_s4 + $0x10] sm:$0xff]  ;;  %s3289_s10 = smov 1   ;;  %s278_s13 = scalar_lea.vmem %s4047_s6, %s3361_s7 }
  0x21   : > { %2857 = vmatmul.mubr.msk.f32.vlgmr.msra.gmra.mxu0 %vm411_vm2, %v3371_v3  ;;  %2862 = vmatmul.mubr.msk.f32.vlgmr.msra.gmra.mxu1 %vm411_vm2, %v3371_v3  ;;  %v3437_v18 = vld [vmem:[%s4045_s4] sm:$0xff]  ;;  %v3459_v44 = vld [vmem:[#allocation2 + $0xf0] sm:$0x3f]  ;;  %v3461_v45 = vld [vmem:[#allocation2 + $0xd8] sm:$0xff] }
  0x22   : > { %2868 = vmatprep.mubr.msk.f32.mxu0 %vm562_vm3, %v3384_v4  ;;  %2875 = vmatpush3.msra.mxu1 %v3412_v12  ;;  %v3466_v46 = vld [vmem:[#allocation2 + $0xc0] sm:$0xff]  ;;  %v3472_v47 = vld [vmem:[#allocation2 + $0x90] ss:$0 sm:$0xff] }
  0x23   : > { %2876 = vmatprep.subr.mxu1 %v3414_v13 }
  0x24   : > { %2877 = vmatpush3.msra.mxu1 %v3414_v13 }
  0x25   : > { %2878 = vmatprep.subr.mxu1 %v3418_v14 }
  0x26   : > { %2879 = vmatpush3.msra.mxu1 %v3418_v14 }
  0x27   : > { %2880 = vmatprep.subr.mxu1 %v3422_v15 }
  0x28   : > { %2881 = vmatpush3.msra.mxu1 %v3422_v15 }
  0x29   : > { %2899 = vmatprep.subr.mxu1 %v4089_v0 }
  0xe1   : > { %v485_v5 = vpop.f32.mrf.mxu0  ;;  %v558_v6 = vpop.f32.mrf.mxu1 }
  0xe2   : > { %2864 = vmatprep.subr.mxu0 %v558_v6 }
  0xe3   : > { %v2858_v7 = vpop.f32.mrf.mxu0  ;;  %v2863_v8 = vpop.f32.mrf.mxu1  ;;  %2865 = vmatpush3.msra.mxu0 %v558_v6 }
  0xe4   : > { %2866 = vmatprep.subr.mxu0 %v485_v5 }
  0xe5   : > { %2867 = vmatpush3.msra.mxu0 %v485_v5 }
  0xe6   : > { %2869 = vmatmul.mubr.msk.f32.vlgmr.msra.gmra.mxu0 %vm562_vm3, %v3391_v9  ;;  %2888 = vmatprep.subr.mxu0 %v4089_v0 }
  0xe7   : > { %2871 = vmatprep.mubr.msk.f32.mxu0 %vm562_vm3, %v3396_v10 }
  0xea   : > { %2872 = vmatmul.mubr.msk.f32.gmra.mxu0 %vm562_vm3, %v3406_v11 }
  0xeb   : > { %2896 = vmatprep.mubr.msk.f32.mxu0 %vm3288_vm0, %v4089_v0 }
 0x1a6   : > { %v2870_v17 = vpop.f32.mrf.mxu0 }
 0x1a7   : > { %v647_v19 = vadd.f32 %v2870_v17, %v3432_v16 }
 0x1a8   : > { %v641_v20 = vpop.f32.mrf.mxu0 }
 0x1a9   : > { %v2655_v22 = vmul.f32 -1.442695, %v647_v19  ;;  %v642_v23 = vadd.f32 %v641_v20, %v3437_v18 }
 0x1aa   : > { %v2873_v24 = vpop.f32.mrf.mxu0 }
 0x1ab   : > { %3154 = vpow2.f32 %v2655_v22  ;;  %v2654_v26 = vmul.f32 -1.442695, %v642_v23  ;;  %v657_v27 = vadd.f32 %v2873_v24, %v3443_v21  ;;  %v3483_v22 = vld [vmem:[%s4044_s3] sm:$0xff]  ;;  %v3489_v24 = vld [vmem:[#allocation2 + $0xa8] sm:$0xff] }
 0x1ac   : > { %v651_v28 = vpop.f32.mrf.mxu0 }
 0x1ad   : > { %3156 = vpow2.f32 %v2654_v26  ;;  %v2657_v29 = vmul.f32 -1.442695, %v657_v27  ;;  %v652_v30 = vadd.f32 %v651_v28, %v3449_v25  ;;  %v3494_v28 = vld [vmem:[#allocation2 + $0x158] sm:$0xf] }
 0x1af   : > { %3158 = vpow2.f32 %v2657_v29  ;;  %v2656_v31 = vmul.f32 -1.442695, %v652_v30  ;;  %v3496_v29 = vld [vmem:[#allocation2 + $0x150] sm:$0xf]  ;;  %v3500_v30 = vld [vmem:[#allocation2 + $0x160] sm:$0xf] }
 0x1b1   : > { %3160 = vpow2.f32 %v2656_v31  ;;  %v3502_v31 = vld [vmem:[#allocation2 + $0x140] sm:$0x1f] }
 0x1b8   : > { %v3155_v32 = vpop.eup %3154 }
 0x1b9   : > { %v673_v34 = vadd.f32 1.0, %v3155_v32  ;;  %v3508_v32 = vld [vmem:[#allocation2 + $0x138] sm:$0x1f] }
 0x1ba   : > { %v3157_v33 = vpop.eup %3156 }
 0x1bb   : > { %v672_v35 = vadd.f32 1.0, %v3157_v33  ;;  %v3513_v33 = vld [vmem:[#allocation2 + $0x128] sm:$0xff] }
 0x1bc   : > { %v3159_v36 = vpop.eup %3158 }
 0x1bd   : > { %3162 = vrcp.f32 %v672_v35  ;;  %v675_v38 = vadd.f32 1.0, %v3159_v36  ;;  %v3524_v35 = vld [vmem:[#allocation2 + $0x148] sm:$0x1f]  ;;  %v3527_v36 = vld [vmem:[#allocation2 + $0x2d8] sm:$0xff] }
 0x1be   : > { %v3161_v37 = vpop.eup %3160  ;;  %3164 = vrcp.f32 %v673_v34  ;;  %v3519_v34 = vld [vmem:[#allocation2 + $0x120] sm:$0xff] }
 0x1bf   : > { %v674_v39 = vadd.f32 1.0, %v3161_v37  ;;  %v3532_v37 = vld [vmem:[#allocation2 + $0x130] sm:$0xff] }
 0x1c1   : > { %3166 = vrcp.f32 %v674_v39 }
 0x1c2   : > { %3168 = vrcp.f32 %v675_v38  ;;  %v3542_v38 = vld [vmem:[#allocation2 + $0x108] ss:$0 sm:$0xff] }
 0x1ca   : > { %v3163_v40 = vpop.eup %3162 }
 0x1cb   : > { %v3165_v41 = vpop.eup %3164  ;;  %2882 = vmatprep.mubr.msk.f32.mxu1 %vm684_vm4, %v3163_v40 }
 0x1cc   : > { %2883 = vmatmul.mubr.msk.f32.vlgmr.msra.gmra.mxu1 %vm684_vm4, %v3165_v41 }
 0x1cd   : > { %2900 = vmatpush3.msk.msra.mxu1 %vm883_vm5, %v3459_v44 }
 0x1ce   : > { %v3167_v42 = vpop.eup %3166  ;;  %2901 = vmatprep.subr.mxu1 %v4089_v0 }
 0x1cf   : > { %v3169_v43 = vpop.eup %3168  ;;  %2885 = vmatprep.mubr.msk.f32.mxu1 %vm684_vm4, %v3167_v42  ;;  %2902 = vmatpush3.msra.mxu1 %v3461_v45 }
 0x1d0   : > { %2886 = vmatmul.mubr.msk.f32.gmra.mxu1 %vm684_vm4, %v3169_v43  ;;  %2903 = vmatprep.subr.mxu1 %v4089_v0 }
 0x1d1   : > { %2907 = vmatprep.mubr.msk.f32.mxu1 %vm3288_vm0, %v4089_v0  ;;  %2904 = vmatpush3.msra.mxu1 %v3466_v46 }
 0x1d2   : > { %2905 = vmatprep.subr.mxu1 %v4089_v0 }
 0x1d3   : > { %2906 = vmatpush3.msra.mxu1 %v3489_v24 }
 0x1d4   : > { %2675 = vmatprep.subr.msk.mxu1 %vm1117_vm7, %v3502_v31 }
 0x28c   : > { %v2884_v48 = vpop.f32.mrf.mxu1 }
 0x28d   : > { %v769_v49 = vadd.f32 %v2884_v48, %v3472_v47  ;;  %v3545_v48 = vld [vmem:[#allocation2 + $0x2d0] sm:$0xff] }
 0x28e   : > { %v763_v50 = vpop.f32.mrf.mxu1 }
 0x28f   : > { %v764_v51 = vadd.f32 %v763_v50, %v3472_v47  ;;  %v2663_v52 = vmul.f32 -1.442695, %v769_v49  ;;  %v3547_v50 = vld [vmem:[#allocation2 + $0x2c0] sm:$0xff] }
 0x290   : > { %v2887_v53 = vpop.f32.mrf.mxu1 }
 0x291   : > { %v779_v54 = vadd.f32 %v2887_v53, %v3472_v47  ;;  %v2662_v55 = vmul.f32 -1.442695, %v764_v51  ;;  %3170 = vpow2.f32 %v2663_v52  ;;  %v3549_v51 = vld [vmem:[#allocation2 + $0x2e0] sm:$0xff]  ;;  %v3553_v52 = vld [vmem:[#allocation2 + $0x2b8] sm:$0xff]  ;;  %v3556_v53 = vld [vmem:[#allocation2 + $0x2a8] sm:$0xff] }
 0x292   : > { %v773_v56 = vpop.f32.mrf.mxu1 }
 0x293   : > { %v2665_v57 = vmul.f32 -1.442695, %v779_v54  ;;  %v774_v58 = vadd.f32 %v773_v56, %v3472_v47  ;;  %v3559_v54 = vld [vmem:[#allocation2 + $0x2c8] sm:$0xff]  ;;  %v3566_v56 = vld [vmem:[#allocation2 + $0x290] sm:$0xff] }
 0x294   : > { %4109 = vst [vmem:[#allocation5_spill] sm:$0xff] %v3566_v56 }
 0x295   : > { %3172 = vpow2.f32 %v2665_v57  ;;  %v2664_v59 = vmul.f32 -1.442695, %v774_v58  ;;  %v3569_v57 = vld [vmem:[#allocation2 + $0x2b0] sm:$0xff]  ;;  %v3572_v58 = vld [vmem:[#allocation2 + $0x288] sm:$0xff] }
 0x296   : > { %3174 = vpow2.f32 %v2662_v55  ;;  %v3562_v55 = vld [vmem:[#allocation2 + $0x2a0] sm:$0xff]  ;;  %4110 = vst [vmem:[#allocation6_spill] sm:$0xff] %v3569_v57  ;;  %4111 = vst [vmem:[#allocation7_spill] sm:$0xff] %v3572_v58 }
 0x297   : > { %3176 = vpow2.f32 %v2664_v59  ;;  %v3576_v59 = vld [vmem:[#allocation2 + $0x278] sm:$0xff] }
 0x298   : > { %4112 = vst [vmem:[#allocation8_spill] sm:$0xff] %v3576_v59 }
 0x29e   : > { %v3171_v60 = vpop.eup %3170 }
 0x29f   : > { %v795_v6 = vadd.f32 1.0, %v3171_v60  ;;  %v3579_v60 = vld [vmem:[#allocation2 + $0x298] sm:$0xff] }
 0x2a0   : > { %4113 = vst [vmem:[#allocation9_spill] sm:$0xff] %v3579_v60 }
 0x2a2   : > { %v3173_v61 = vpop.eup %3172 }
 0x2a3   : > { %v3175_v62 = vpop.eup %3174  ;;  %v797_v63 = vadd.f32 1.0, %v3173_v61  ;;  %v3582_v61 = vld [vmem:[#allocation2 + $0x270] sm:$0xff] }
 0x2a4   : > { %v3177_v5 = vpop.eup %3176  ;;  %v794_v8 = vadd.f32 1.0, %v3175_v62  ;;  %4114 = vst [vmem:[#allocation10_spill] sm:$0xff] %v3582_v61  ;;  %v3586_v62 = vld [vmem:[#allocation2 + $0x260] sm:$0xff] }
 0x2a5   : > { %3178 = vrcp.f32 %v797_v63  ;;  %v796_v7 = vadd.f32 1.0, %v3177_v5  ;;  %4115 = vst [vmem:[#allocation11_spill] sm:$0xff] %v3586_v62  ;;  %v3589_v63 = vld [vmem:[#allocation2 + $0x280] sm:$0xff]  ;;  %v3592_v5 = vld [vmem:[#allocation2 + $0x258] sm:$0xff] }
 0x2a6   : > { %4116 = vst [vmem:[#allocation12_spill] sm:$0xff] %v3589_v63  ;;  %4117 = vst [vmem:[#allocation13_spill] sm:$0xff] %v3592_v5 }
 0x2a7   : > { %3180 = vrcp.f32 %v796_v7  ;;  %v3599_v7 = vld [vmem:[#allocation2 + $0x268] sm:$0xff] }
 0x2a8   : > { %3182 = vrcp.f32 %v795_v6  ;;  %v3596_v6 = vld [vmem:[#allocation2 + $0x248] sm:$0xff]  ;;  %4119 = vst [vmem:[#allocation15_spill] sm:$0xff] %v3599_v7 }
 0x2a9   : > { %3184 = vrcp.f32 %v794_v8  ;;  %4118 = vst [vmem:[#allocation14_spill] sm:$0xff] %v3596_v6  ;;  %v3602_v8 = vld [vmem:[#allocation2 + $0x240] sm:$0xff] }
 0x2aa   : > { %4120 = vst [vmem:[#allocation16_spill] sm:$0xff] %v3602_v8 }
 0x2b2   : > { %v3179_v17 = vpop.eup %3178 }
 0x2b3   : > { %2889 = vmatpush3.msra.mxu0 %v3179_v17  ;;  %v3606_v17 = vld [vmem:[#allocation2 + $0x230] sm:$0xff] }
 0x2b4   : > { %v3181_v19 = vpop.eup %3180  ;;  %2890 = vmatprep.subr.mxu0 %v4089_v0  ;;  %4121 = vst [vmem:[#allocation17_spill] sm:$0xff] %v3606_v17 }
 0x2b5   : > { %2891 = vmatpush3.msra.mxu0 %v3181_v19  ;;  %v3183_v20 = vpop.eup %3182  ;;  %v3609_v19 = vld [vmem:[#allocation2 + $0x250] sm:$0xff] }
 0x2b6   : > { %2892 = vmatprep.subr.mxu0 %v4089_v0  ;;  %v3185_v23 = vpop.eup %3184  ;;  %4122 = vst [vmem:[#allocation18_spill] sm:$0xff] %v3609_v19 }
 0x2b7   : > { %2893 = vmatpush3.msra.mxu0 %v3183_v20  ;;  %v3612_v20 = vld [vmem:[#allocation2 + $0x228] sm:$0xff] }
 0x2b8   : > { %2894 = vmatprep.subr.mxu0 %v4089_v0  ;;  %4123 = vst [vmem:[#allocation19_spill] sm:$0xff] %v3612_v20 }
 0x2b9   : > { %2895 = vmatpush3.msra.mxu0 %v3185_v23  ;;  %v3616_v23 = vld [vmem:[#allocation2 + $0x218] sm:$0xff] }
 0x2ba   : > { %2897 = vmatmul.mubr.msk.f32.vlgmr.msra.gmra.mxu0 %vm684_vm4, %v3483_v22  ;;  %2670 = vmatprep.subr.msk.mxu0 %vm415_vm1, %v3494_v28  ;;  %4124 = vst [vmem:[#allocation20_spill] sm:$0xff] %v3616_v23 }
 0x2bb   : > { %1036 = vmatprep.mubr.f32.mxu0 %v4089_v0  ;;  %2671 = vmatpush1.msk.msra.mxu0 %vm415_vm1, %v3496_v29 }
 0x2bc   : > { %2910 = vmatprep.subr.mxu0 %v4089_v0 }
 0x2be   : > { %2672 = vmatmul.mubr.msk.f32.vlgmr.msra.gmra.mxu0 %vm411_vm2, %v3371_v3 }
 0x2bf   : > { %2911 = vmatpush3.msk.msra.mxu0 %vm415_vm1, %v3500_v30  ;;  %2912 = vmatprep.mubr.msk.f32.mxu0 %vm3288_vm0, %v4089_v0 }
 0x2c0   : > { %2915 = vmatprep.subr.mxu0 %v4089_v0 }
 0x2c2   : > { %2913 = vmatmul.mubr.msk.f32.vlgmr.msra.gmra.mxu0 %vm411_vm2, %v3371_v3 }
 0x2c3   : > { %2916 = vmatpush3.msk.msra.mxu0 %vm1117_vm7, %v3524_v35  ;;  %2919 = vmatprep.mubr.msk.f32.mxu0 %vm3288_vm0, %v4089_v0 }
 0x2c4   : > { %2917 = vmatprep.subr.mxu0 %v4089_v0 }
 0x2c5   : > { %2918 = vmatpush3.msra.mxu0 %v3532_v37 }
 0x2c6   : > { %2922 = vmatprep.subr.mxu0 %v4089_v0 }
 0x37a   : > { %v875_v26 = vpop.f32.mrf.mxu0 }
 0x37b   : > { %2908 = vmatmul.mubr.msk.f32.vlgmr.msra.gmra.mxu1 %vm879_vm6, %v875_v26  ;;  %v3619_v26 = vld [vmem:[#allocation2 + $0x238] sm:$0xff] }
 0x37c   : > { %v2898_v27 = vpop.f32.mrf.mxu0  ;;  %1191 = vmatprep.mubr.f32.mxu1 %v4089_v0  ;;  %2676 = vmatpush1.msk.msra.mxu1 %vm1117_vm7, %v3508_v32  ;;  %4125 = vst [vmem:[#allocation21_spill] sm:$0xff] %v3619_v26 }
 0x37d   : > { %1157 = vmatprep.subr.mxu1 %v3513_v33  ;;  %v3622_v27 = vld [vmem:[#allocation2 + $0x210] sm:$0xff] }
 0x37e   : > { %1158 = vmatpush1.msra.mxu1 %v3519_v34  ;;  %4126 = vst [vmem:[#allocation22_spill] sm:$0xff] %v3622_v27 }
 0x37f   : > { %1271 = vmatprep.subr.mxu1 %v3527_v36 }
 0x43b   : > { %v953_v3 = vpop.f32.mrf.mxu1 }
 0x43c   : > { %v954_v39 = vadd.f32 %v953_v3, %v3542_v38  ;;  %v3626_v3 = vld [vmem:[#allocation2 + $0x200] sm:$0xff] }
 0x43d   : > { %v2909_v40 = vpop.f32.mrf.mxu1  ;;  %4127 = vst [vmem:[#allocation23_spill] sm:$0xff] %v3626_v3 }
 0x43e   : > { %v2669_v41 = vmul.f32 -1.442695, %v954_v39  ;;  %v3629_v39 = vld [vmem:[#allocation2 + $0x220] sm:$0xff]  ;;  %v3632_v40 = vld [vmem:[#allocation2 + $0x1f8] sm:$0xff] }
 0x43f   : > { %4128 = vst [vmem:[#allocation24_spill] sm:$0xff] %v3629_v39  ;;  %4129 = vst [vmem:[#allocation25_spill] sm:$0xff] %v3632_v40 }
 0x440   : > { %3186 = vpow2.f32 %v2669_v41  ;;  %v3636_v41 = vld [vmem:[#allocation2 + $0x1e8] sm:$0xff] }
 0x441   : > { %4130 = vst [vmem:[#allocation26_spill] sm:$0xff] %v3636_v41 }
 0x44d   : > { %v3187_v42 = vpop.eup %3186 }
 0x44e   : > { %v960_v43 = vadd.f32 1.0, %v3187_v42  ;;  %v3639_v42 = vld [vmem:[#allocation2 + $0x208] sm:$0xff] }
 0x44f   : > { %4131 = vst [vmem:[#allocation27_spill] sm:$0xff] %v3639_v42 }
 0x450   : > { %3188 = vrcp.f32 %v960_v43  ;;  %v3642_v43 = vld [vmem:[#allocation2 + $0x1e0] sm:$0xff] }
 0x451   : > { %4132 = vst [vmem:[#allocation28_spill] sm:$0xff] %v3642_v43 }
 0x45d   : > { %v3189_v49 = vpop.eup %3188 }
 0x45e   : > { %2677 = vmatmul.mubr.msk.f32.vlgmr.msra.gmra.mxu1 %vm1113_vm8, %v3189_v49  ;;  %2920 = vmatmul.mubr.msk.f32.vlgmr.msra.gmra.mxu0 %vm1113_vm8, %v3189_v49  ;;  %v3646_v49 = vld [vmem:[#allocation2 + $0x1d0] sm:$0xff] }
 0x45f   : > { %1272 = vmatpush1.msra.mxu1 %v3545_v48  ;;  %1335 = vmatprep.mubr.f32.mxu1 %v4089_v0  ;;  %4133 = vst [vmem:[#allocation29_spill] sm:$0xff] %v3646_v49 }
 0x460   : > { %1273 = vmatprep.subr.mxu1 %v3547_v50  ;;  %2923 = vmatpush3.msra.mxu0 %v3549_v51 }
 0x461   : > { %1274 = vmatpush1.msra.mxu1 %v3553_v52  ;;  %2924 = vmatprep.subr.mxu0 %v4089_v0 }
 0x462   : > { %1275 = vmatprep.subr.mxu1 %v3556_v53  ;;  %2925 = vmatpush3.msra.mxu0 %v3559_v54 }
 0x463   : > { %1276 = vmatpush1.msra.mxu1 %v3562_v55  ;;  %2926 = vmatprep.subr.mxu0 %v4089_v0 }
 0x464   : > { %1277 = vmatprep.subr.mxu1 %v3566_v56  ;;  %2927 = vmatpush3.msra.mxu0 %v3569_v57 }
 0x465   : > { %1278 = vmatpush1.msra.mxu1 %v3572_v58  ;;  %2928 = vmatprep.subr.mxu0 %v4089_v0 }
 0x466   : > { %1279 = vmatprep.subr.mxu1 %v3576_v59  ;;  %2929 = vmatpush3.msra.mxu0 %v3579_v60 }
 0x467   : > { %1280 = vmatpush1.msra.mxu1 %v3582_v61  ;;  %2930 = vmatprep.subr.mxu0 %v4089_v0 }
 0x468   : > { %1281 = vmatprep.subr.mxu1 %v3586_v62  ;;  %2931 = vmatpush3.msra.mxu0 %v3589_v63 }
 0x469   : > { %1282 = vmatpush1.msra.mxu1 %v3592_v5  ;;  %2932 = vmatprep.subr.mxu0 %v4089_v0 }
 0x46a   : > { %1283 = vmatprep.subr.mxu1 %v3596_v6  ;;  %2933 = vmatpush3.msra.mxu0 %v3599_v7 }
 0x46b   : > { %1284 = vmatpush1.msra.mxu1 %v3602_v8  ;;  %2934 = vmatprep.subr.mxu0 %v4089_v0 }
 0x46c   : > { %1285 = vmatprep.subr.mxu1 %v3606_v17  ;;  %2935 = vmatpush3.msra.mxu0 %v3609_v19 }
 0x46d   : > { %1286 = vmatpush1.msra.mxu1 %v3612_v20  ;;  %2936 = vmatprep.subr.mxu0 %v4089_v0 }
 0x46e   : > { %1287 = vmatprep.subr.mxu1 %v3616_v23  ;;  %2937 = vmatpush3.msra.mxu0 %v3619_v26  ;;  %v3649_v23 = vld [vmem:[#allocation2 + $0x1f0] sm:$0xff] }
 0x46f   : > { %1288 = vmatpush1.msra.mxu1 %v3622_v27  ;;  %2938 = vmatprep.subr.mxu0 %v4089_v0  ;;  %4134 = vst [vmem:[#allocation30_spill] sm:$0xff] %v3649_v23  ;;  %v3652_v27 = vld [vmem:[#allocation2 + $0x1c8] sm:$0xff] }
 0x470   : > { %1289 = vmatprep.subr.mxu1 %v3626_v3  ;;  %2939 = vmatpush3.msra.mxu0 %v3629_v39  ;;  %4135 = vst [vmem:[#allocation31_spill] sm:$0xff] %v3652_v27  ;;  %v3656_v3 = vld [vmem:[#allocation2 + $0x1b8] sm:$0xff] }
 0x471   : > { %1290 = vmatpush1.msra.mxu1 %v3632_v40  ;;  %2940 = vmatprep.subr.mxu0 %v4089_v0  ;;  %4136 = vst [vmem:[#allocation32_spill] sm:$0xff] %v3656_v3  ;;  %v3659_v39 = vld [vmem:[#allocation2 + $0x1d8] sm:$0xff]  ;;  %v3662_v40 = vld [vmem:[#allocation2 + $0x1b0] sm:$0xff] }
 0x472   : > { %1291 = vmatprep.subr.mxu1 %v3636_v41  ;;  %2941 = vmatpush3.msra.mxu0 %v3639_v42  ;;  %4137 = vst [vmem:[#allocation33_spill] sm:$0xff] %v3659_v39  ;;  %4138 = vst [vmem:[#allocation34_spill] sm:$0xff] %v3662_v40  ;;  %v3666_v41 = vld [vmem:[#allocation2 + $0x1a0] sm:$0xff] }
 0x473   : > { %1292 = vmatpush1.msra.mxu1 %v3642_v43  ;;  %2942 = vmatprep.subr.mxu0 %v4089_v0  ;;  %4139 = vst [vmem:[#allocation35_spill] sm:$0xff] %v3666_v41  ;;  %v3669_v42 = vld [vmem:[#allocation2 + $0x1c0] sm:$0xff]  ;;  %v3672_v43 = vld [vmem:[#allocation2 + $0x198] sm:$0xff] }
 0x474   : > { %1293 = vmatprep.subr.mxu1 %v3646_v49  ;;  %2943 = vmatpush3.msra.mxu0 %v3649_v23  ;;  %4140 = vst [vmem:[#allocation36_spill] sm:$0xff] %v3669_v42  ;;  %4141 = vst [vmem:[#allocation37_spill] sm:$0xff] %v3672_v43  ;;  %v3676_v49 = vld [vmem:[#allocation2 + $0x188] sm:$0xff] }
 0x475   : > { %1294 = vmatpush1.msra.mxu1 %v3652_v27  ;;  %2944 = vmatprep.subr.mxu0 %v4089_v0  ;;  %4142 = vst [vmem:[#allocation38_spill] sm:$0xff] %v3676_v49  ;;  %v3679_v23 = vld [vmem:[#allocation2 + $0x1a8] sm:$0xff]  ;;  %v3682_v27 = vld [vmem:[#allocation2 + $0x180] sm:$0xff] }
 0x476   : > { %1295 = vmatprep.subr.mxu1 %v3656_v3  ;;  %2945 = vmatpush3.msra.mxu0 %v3659_v39  ;;  %4143 = vst [vmem:[#allocation39_spill] sm:$0xff] %v3679_v23  ;;  %4144 = vst [vmem:[#allocation40_spill] sm:$0xff] %v3682_v27  ;;  %v3686_v3 = vld [vmem:[#allocation2 + $0x170] sm:$0xff] }
 0x477   : > { %1296 = vmatpush1.msra.mxu1 %v3662_v40  ;;  %2946 = vmatprep.subr.mxu0 %v4089_v0  ;;  %4145 = vst [vmem:[#allocation41_spill] sm:$0xff] %v3686_v3  ;;  %v3689_v39 = vld [vmem:[#allocation2 + $0x190] sm:$0xff]  ;;  %v3692_v40 = vld [vmem:[#allocation2 + $0x168] sm:$0xff] }
 0x478   : > { %1297 = vmatprep.subr.mxu1 %v3666_v41  ;;  %2947 = vmatpush3.msra.mxu0 %v3669_v42  ;;  %4146 = vst [vmem:[#allocation42_spill] sm:$0xff] %v3689_v39  ;;  %4147 = vst [vmem:[#allocation43_spill] sm:$0xff] %v3692_v40  ;;  %v3697_v41 = vld [vmem:[#allocation2 + $0x178] sm:$0xff] }
 0x479   : > { %1298 = vmatpush1.msra.mxu1 %v3672_v43  ;;  %2948 = vmatprep.subr.mxu0 %v4089_v0  ;;  %4148 = vst [vmem:[#allocation44_spill] sm:$0xff] %v3697_v41  ;;  %v377_v43 = vlaneseq }
 0x47a   : > { %1299 = vmatprep.subr.mxu1 %v3676_v49  ;;  %2949 = vmatpush3.msra.mxu0 %v3679_v23  ;;  %v3725_v49 = vld [vmem:[#allocation2 + $0x468] sm:$0xff]  ;;  %v3735_v23 = vld [vmem:[#allocation2 + $0x438] sm:$0xff] }
 0x47b   : > { %1300 = vmatpush1.msra.mxu1 %v3682_v27  ;;  %2950 = vmatprep.subr.mxu0 %v4089_v0  ;;  %v3723_v27 = vld [vmem:[#allocation2 + $0x480] sm:$0xff]  ;;  %4150 = vst [vmem:[#allocation46_spill] sm:$0xff] %v3725_v49  ;;  %4152 = vst [vmem:[#allocation48_spill] sm:$0xff] %v3735_v23  ;;  %v378_v42 = vshrl.u32 %v377_v43, 7 }
 0x47c   : > { %1301 = vmatprep.subr.mxu1 %v3686_v3  ;;  %2951 = vmatpush3.msra.mxu0 %v3689_v39  ;;  %4149 = vst [vmem:[#allocation45_spill] sm:$0xff] %v3723_v27 }
 0x47d   : > { %1302 = vmatpush1.msra.mxu1 %v3692_v40  ;;  %2952 = vmatprep.subr.mxu0 %v4089_v0  ;;  %v379_v26 = vsub.s32 0, %v378_v42  ;;  %v383_v6 = vsub.s32 1, %v378_v42 }
 0x47e   : > { %1336 = vmatmul.mubr.f32.vlgmr.msra.gmra.mxu1 %v4089_v0  ;;  %2953 = vmatpush3.msra.mxu0 %v3697_v41  ;;  %v3717_v41 = vpop.f32.mrf.mxu0 }
 0x47f   : > { %2954 = vmatprep.mubr.msk.f32.mxu0 %vm3288_vm0, %v4089_v0  ;;  %2957 = vmatprep.subr.mxu1 %v4089_v0 }
 0x480   : > { %2955 = vmatmul.mubr.f32.vlgmr.msra.gmra.mxu0 %v4089_v0  ;;  %2989 = vmatprep.mubr.msk.f32.mxu1 %vm3288_vm0, %v4089_v0  ;;  %v3719_v40 = vpop.f32.mrf.mxu0 }
 0x481   : > { %2992 = vmatprep.subr.mxu0 %v4089_v0  ;;  %2994 = vmatprep.mubr.msk.f32.mxu0 %vm3288_vm0, %v4089_v0 }
 0x482   : > { %2993 = vmatpush3.msk.msra.mxu0 %vm415_vm1, %v3367_v1  ;;  %v3721_v3 = vpop.f32.mrf.mxu0  ;;  %2958 = vmatpush3.msra.mxu1 %v3723_v27  ;;  %v3731_v1 = vld [vmem:[#allocation2 + $0x450] sm:$0xff]  ;;  %v3753_v27 = vld [vmem:[#allocation2 + $0x3c0] sm:$0xff] }
 0x483   : > { %2997 = vmatprep.subr.mxu0 %v4089_v0  ;;  %2959 = vmatprep.subr.mxu1 %v4089_v0  ;;  %4151 = vst [vmem:[#allocation47_spill] sm:$0xff] %v3731_v1  ;;  %4157 = vst [vmem:[#allocation53_spill] sm:$0xff] %v3753_v27 }
 0x484   : > { %v2914_v39 = vpop.f32.mrf.mxu0  ;;  %2960 = vmatpush3.msra.mxu1 %v3725_v49  ;;  %v3743_v49 = vld [vmem:[#allocation2 + $0x408] sm:$0xff] }
 0x485   : > { %2961 = vmatprep.subr.mxu1 %v4089_v0  ;;  %v3739_v39 = vld [vmem:[#allocation2 + $0x420] sm:$0xff]  ;;  %4154 = vst [vmem:[#allocation50_spill] sm:$0xff] %v3743_v49 }
 0x486   : > { %2962 = vmatpush3.msra.mxu1 %v3731_v1  ;;  %4153 = vst [vmem:[#allocation49_spill] sm:$0xff] %v3739_v39  ;;  %v3747_v1 = vld [vmem:[#allocation2 + $0x3f0] sm:$0xff] }
 0x487   : > { %2963 = vmatprep.subr.mxu1 %v4089_v0  ;;  %4155 = vst [vmem:[#allocation51_spill] sm:$0xff] %v3747_v1 }
 0x488   : > { %2964 = vmatpush3.msra.mxu1 %v3735_v23  ;;  %v3751_v23 = vld [vmem:[#allocation2 + $0x3d8] sm:$0xff] }
 0x489   : > { %2965 = vmatprep.subr.mxu1 %v4089_v0  ;;  %4156 = vst [vmem:[#allocation52_spill] sm:$0xff] %v3751_v23 }
 0x48a   : > { %2966 = vmatpush3.msra.mxu1 %v3739_v39  ;;  %v3757_v39 = vld [vmem:[#allocation2 + $0x3a8] sm:$0xff] }
 0x48b   : > { %2967 = vmatprep.subr.mxu1 %v4089_v0  ;;  %4158 = vst [vmem:[#allocation54_spill] sm:$0xff] %v3757_v39 }
 0x48c   : > { %2968 = vmatpush3.msra.mxu1 %v3743_v49  ;;  %v3761_v49 = vld [vmem:[#allocation2 + $0x390] sm:$0xff] }
 0x48d   : > { %2969 = vmatprep.subr.mxu1 %v4089_v0  ;;  %4159 = vst [vmem:[#allocation55_spill] sm:$0xff] %v3761_v49 }
 0x48e   : > { %2970 = vmatpush3.msra.mxu1 %v3747_v1  ;;  %v3765_v1 = vld [vmem:[#allocation2 + $0x378] sm:$0xff] }
 0x48f   : > { %2971 = vmatprep.subr.mxu1 %v4089_v0  ;;  %4160 = vst [vmem:[#allocation56_spill] sm:$0xff] %v3765_v1 }
 0x490   : > { %2972 = vmatpush3.msra.mxu1 %v3751_v23  ;;  %v3769_v23 = vld [vmem:[#allocation2 + $0x360] sm:$0xff] }
 0x491   : > { %2973 = vmatprep.subr.mxu1 %v4089_v0  ;;  %4161 = vst [vmem:[#allocation57_spill] sm:$0xff] %v3769_v23 }
 0x492   : > { %2974 = vmatpush3.msra.mxu1 %v3753_v27  ;;  %v3773_v27 = vld [vmem:[#allocation2 + $0x348] sm:$0xff] }
 0x493   : > { %2975 = vmatprep.subr.mxu1 %v4089_v0  ;;  %4162 = vst [vmem:[#allocation58_spill] sm:$0xff] %v3773_v27 }
 0x494   : > { %2976 = vmatpush3.msra.mxu1 %v3757_v39  ;;  %v3777_v39 = vld [vmem:[#allocation2 + $0x330] sm:$0xff] }
 0x495   : > { %2977 = vmatprep.subr.mxu1 %v4089_v0  ;;  %4163 = vst [vmem:[#allocation59_spill] sm:$0xff] %v3777_v39 }
 0x496   : > { %2978 = vmatpush3.msra.mxu1 %v3761_v49  ;;  %v3781_v49 = vld [vmem:[#allocation2 + $0x318] sm:$0xff] }
 0x497   : > { %2979 = vmatprep.subr.mxu1 %v4089_v0  ;;  %4164 = vst [vmem:[#allocation60_spill] sm:$0xff] %v3781_v49 }
 0x498   : > { %2980 = vmatpush3.msra.mxu1 %v3765_v1 }
 0x499   : > { %2981 = vmatprep.subr.mxu1 %v4089_v0 }
 0x49a   : > { %2982 = vmatpush3.msra.mxu1 %v3769_v23  ;;  %v1503_v23 = vld [vmem:[%s274_s9] sm:$0xff] }
 0x49b   : > { %2983 = vmatprep.subr.mxu1 %v4089_v0  ;;  %1505 = vrot.lane.b32.xlu0 %v1503_v23, %s3289_s10 }
 0x49c   : > { %2984 = vmatpush3.msra.mxu1 %v3773_v27 }
 0x49d   : > { %2985 = vmatprep.subr.mxu1 %v4089_v0 }
 0x49e   : > { %2986 = vmatpush3.msra.mxu1 %v3777_v39  ;;  %v375_v39 = vld [vmem:[#allocation2 + $0x2e8] ss:$8 sm:$0x7] }
 0x49f   : > { %2987 = vmatprep.subr.mxu1 %v4089_v0  ;;  %v393_v0 = vld [vmem:[#allocation2 + $0x300] ss:$8 sm:$0x7]  ;;  %v3792_v17 = vrot.slane %v375_v39, %v379_v26  ;;  %v3801_v63 = vrot.slane %v375_v39, %v383_v6 }
 0x4a0   : > { %2988 = vmatpush3.msra.mxu1 %v3781_v49  ;;  %v3795_v19 = vrot.slane %v393_v0, %v379_v26 }
 0x4a1   : > { %3012 = vmatprep.subr.mxu1 %v3412_v12  ;;  %4165 = vst [vmem:[#allocation61_spill] sm:$0xff] %v3792_v17 }
 0x4a2   : > { %4166 = vst [vmem:[#allocation62_spill] sm:$0xff] %v3795_v19 }
 0x51e   : > { %v1264_v27 = vpop.f32.mrf.mxu0  ;;  %v1193_v20 = vpop.f32.mrf.mxu1 }
 0x51f   : > { %v1194_v49 = vadd.f32 %v1193_v20, %v3717_v41 }
 0x520   : > { %v2921_v1 = vpop.f32.mrf.mxu0  ;;  %v1195_v8 = vpop.f32.mrf.mxu1 }
 0x521   : > { %v1268_v5 = vadd.f32 %v1194_v49, %v3792_v17  ;;  %v3799_v1 = vrot.slane %v393_v0, %v383_v6  ;;  %v1196_v61 = vadd.f32 %v1195_v8, %v3719_v40  ;;  %v387_v17 = vsub.s32 2, %v378_v42 }
 0x523   : > { %v1269_v41 = vadd.f32 %v1196_v61, %v3801_v63  ;;  %v3806_v56 = vrot.slane %v393_v0, %v387_v17  ;;  %v3808_v57 = vrot.slane %v375_v39, %v387_v17  ;;  %v3824_v17 = vld [vmem:[#allocation2 + $0x498] ss:$0 sm:$0xff] }
 0x53e   : > { %v1337_v7 = vpop.f32.mrf.mxu1 }
 0x53f   : > { %v1338_v23 = vadd.f32 %v1337_v7, %v3795_v19 }
 0x540   : > { %v1339_v43 = vpop.f32.mrf.mxu1  ;;  %v1408_v62 = vpop.f32.mrf.mxu0 }
 0x541   : > { %v1412_v59 = vadd.f32 %v1338_v23, %v1268_v5  ;;  %v1340_v26 = vadd.f32 %v1339_v43, %v3799_v1  ;;  %v1409_v5 = vadd.f32 %v1408_v62, %v3806_v56  ;;  %v4167_v62 = vmov 0.0  }
 0x542   : > { %v2956_v60 = vpop.f32.mrf.mxu0 }
 0x543   : > { %v2680_v20 = vmul.f32 -1.442695, %v1412_v59  ;;  %v1419_v58 = vadd.f32 %v1340_v26, %v1269_v41  ;;  %v1265_v60 = vadd.f32 %v1264_v27, %v3721_v3  ;;  %v1506_v3 = vpop.permute.xlu0 %1505 }
 0x545   : > { %3190 = vpow2.f32 %v2680_v20  ;;  %v2681_v49 = vmul.f32 -1.442695, %v1419_v58  ;;  %v1270_v61 = vadd.f32 %v1265_v60, %v3808_v57 }
 0x547   : > { %3192 = vpow2.f32 %v2681_v49 }
 0x552   : > { %v3191_v7 = vpop.eup %3190 }
 0x553   : > { %v1416_v19 = vadd.f32 1.0, %v3191_v7 }
 0x554   : > { %v3193_v6 = vpop.eup %3192 }
 0x555   : > { %3194 = vrcp.f32 %v1416_v19  ;;  %v1423_v59 = vadd.f32 1.0, %v3193_v6 }
 0x557   : > { %3196 = vrcp.f32 %v1423_v59 }
 0x562   : > { %v3195_v8 = vpop.eup %3194 }
 0x563   : > { %v1426_v58 = vmul.f32 %v3195_v8, %v1409_v5 }
 0x564   : > { %v3197_v23 = vpop.eup %3196 }
 0x565   : > { %v1427_v40 = vadd.f32 %v1426_v58, %v1270_v61  ;;  %v1429_v19 = vsub.f32 1.0, %v3197_v23  ;;  %v1431_v43 = vmul.f32 0.0, %v3197_v23 }
 0x567   : > { %3198 = vtanh.f32 %v1427_v40 }
 0x574   : > { %v3199_v42 = vpop.eup %3198 }
 0x575   : > { %v1430_v0 = vmul.f32 %v3199_v42, %v1429_v19 }
 0x577   : > { %v3813_v20 = vadd.f32 %v1431_v43, %v1430_v0 }
 0x579   : > { %2990 = vmatmul.mubr.f32.vlgmr.msra.gmra.mxu1 %v3813_v20 }
 0x57a   : > { %3013 = vmatpush3.msra.mxu1 %v3412_v12 }
 0x57b   : > { %3014 = vmatprep.subr.mxu1 %v3414_v13 }
 0x57c   : > { %3015 = vmatpush3.msra.mxu1 %v3414_v13 }
 0x57d   : > { %3016 = vmatprep.subr.mxu1 %v3418_v14 }
 0x57e   : > { %3017 = vmatpush3.msra.mxu1 %v3418_v14 }
 0x57f   : > { %3018 = vmatprep.subr.mxu1 %v3422_v15 }
 0x580   : > { %3019 = vmatpush3.msra.mxu1 %v3422_v15 }
 0x581   : > { %3026 = vmatprep.subr.mxu1 %v4167_v62 }
 0x639   : > { %v1499_v27 = vpop.f32.mrf.mxu1 }
 0x63a   : > { %v3827_v12 = vadd.f32 %v1499_v27, %v3824_v17 }
 0x63b   : > { %v2991_v39 = vpop.f32.mrf.mxu1 }
 0x63c   : > { %v3831_v13 = vsel %vm1508_vm9, %v3827_v12, %v1506_v3 }
 0x63d   : > { %2995 = vmatmul.mubr.msk.f32.vlgmr.msra.gmra.mxu0 %vm411_vm2, %v3831_v13 }
 0x63e   : > { %2998 = vmatpush3.msk.msra.mxu0 %vm415_vm1, %v3369_v2  ;;  %2999 = vmatprep.mubr.msk.f32.mxu0 %vm3288_vm0, %v4167_v62 }
 0x641   : > { %3000 = vmatmul.mubr.msk.f32.vlgmr.msra.gmra.mxu0 %vm411_vm2, %v3831_v13 }
 0x642   : > { %3006 = vmatprep.mubr.msk.f32.mxu0 %vm562_vm3, %v3384_v4 }
 0x6fd   : > { %v1579_v14 = vpop.f32.mrf.mxu0 }
 0x6ff   : > { %v2996_v15 = vpop.f32.mrf.mxu0 }
 0x701   : > { %v1649_v26 = vpop.f32.mrf.mxu0 }
 0x702   : > { %3002 = vmatprep.subr.mxu0 %v1649_v26 }
 0x703   : > { %v3001_v41 = vpop.f32.mrf.mxu0  ;;  %3003 = vmatpush3.msra.mxu0 %v1649_v26 }
 0x704   : > { %3004 = vmatprep.subr.mxu0 %v1579_v14 }
 0x705   : > { %3005 = vmatpush3.msra.mxu0 %v1579_v14 }
 0x706   : > { %3007 = vmatmul.mubr.msk.f32.vlgmr.msra.gmra.mxu0 %vm562_vm3, %v3391_v9  ;;  %3037 = vmatprep.subr.mxu0 %v4167_v62 }
 0x707   : > { %3009 = vmatprep.mubr.msk.f32.mxu0 %vm562_vm3, %v3396_v10  ;;  %3038 = vmatpush3.msk.msra.mxu0 %vm883_vm5, %v3459_v44 }
 0x708   : > { %3039 = vmatprep.subr.mxu0 %v4167_v62 }
 0x709   : > { %3040 = vmatpush3.msra.mxu0 %v3461_v45 }
 0x70a   : > { %3010 = vmatmul.mubr.msk.f32.gmra.mxu0 %vm562_vm3, %v3406_v11  ;;  %3041 = vmatprep.subr.mxu0 %v4167_v62 }
 0x70b   : > { %3042 = vmatpush3.msra.mxu0 %v3466_v46  ;;  %3045 = vmatprep.mubr.msk.f32.mxu0 %vm3288_vm0, %v4167_v62 }
 0x70c   : > { %3043 = vmatprep.subr.mxu0 %v4167_v62 }
 0x70d   : > { %3044 = vmatpush3.msra.mxu0 %v3489_v24 }
 0x70e   : > { %2711 = vmatprep.subr.msk.mxu0 %vm1117_vm7, %v3502_v31 }
 0x7c6   : > { %v3008_v2 = vpop.f32.mrf.mxu0 }
 0x7c7   : > { %v1725_v4 = vadd.f32 %v3008_v2, %v3432_v16 }
 0x7c8   : > { %v1719_v9 = vpop.f32.mrf.mxu0 }
 0x7c9   : > { %v2691_v10 = vmul.f32 -1.442695, %v1725_v4  ;;  %v1720_v11 = vadd.f32 %v1719_v9, %v3437_v18 }
 0x7ca   : > { %v3011_v44 = vpop.f32.mrf.mxu0 }
 0x7cb   : > { %3200 = vpow2.f32 %v2691_v10  ;;  %v2690_v45 = vmul.f32 -1.442695, %v1720_v11  ;;  %v1735_v46 = vadd.f32 %v3011_v44, %v3443_v21 }
 0x7cc   : > { %v1729_v49 = vpop.f32.mrf.mxu0 }
 0x7cd   : > { %3202 = vpow2.f32 %v2690_v45  ;;  %v2693_v7 = vmul.f32 -1.442695, %v1735_v46  ;;  %v1730_v24 = vadd.f32 %v1729_v49, %v3449_v25 }
 0x7cf   : > { %3204 = vpow2.f32 %v2693_v7  ;;  %v2692_v6 = vmul.f32 -1.442695, %v1730_v24 }
 0x7d1   : > { %3206 = vpow2.f32 %v2692_v6 }
 0x7d8   : > { %v3201_v31 = vpop.eup %3200 }
 0x7d9   : > { %v1751_v16 = vadd.f32 1.0, %v3201_v31 }
 0x7da   : > { %v3203_v60 = vpop.eup %3202 }
 0x7db   : > { %v1750_v59 = vadd.f32 1.0, %v3203_v60 }
 0x7dc   : > { %v3205_v5 = vpop.eup %3204 }
 0x7dd   : > { %3208 = vrcp.f32 %v1750_v59  ;;  %v1753_v8 = vadd.f32 1.0, %v3205_v5  ;;  %v4178_v59 = vld [vmem:[#allocation14_spill] sm:$0xff]  ;;  %v4179_v5 = vld [vmem:[#allocation16_spill] sm:$0xff] }
 0x7de   : > { %v3207_v18 = vpop.eup %3206  ;;  %3210 = vrcp.f32 %v1751_v16 }
 0x7df   : > { %v1752_v61 = vadd.f32 1.0, %v3207_v18  ;;  %v4180_v18 = vld [vmem:[#allocation18_spill] sm:$0xff] }
 0x7e1   : > { %3212 = vrcp.f32 %v1752_v61  ;;  %v4182_v61 = vld [vmem:[#allocation19_spill] sm:$0xff] }
 0x7e2   : > { %3214 = vrcp.f32 %v1753_v8  ;;  %v4181_v8 = vld [vmem:[#allocation17_spill] sm:$0xff] }
 0x7ea   : > { %v3209_v21 = vpop.eup %3208 }
 0x7eb   : > { %v3211_v58 = vpop.eup %3210  ;;  %3020 = vmatprep.mubr.msk.f32.mxu1 %vm684_vm4, %v3209_v21  ;;  %v4183_v21 = vld [vmem:[#allocation21_spill] sm:$0xff] }
 0x7ec   : > { %3021 = vmatmul.mubr.msk.f32.vlgmr.msra.gmra.mxu1 %vm684_vm4, %v3211_v58  ;;  %v4184_v58 = vld [vmem:[#allocation20_spill] sm:$0xff] }
 0x7ee   : > { %v3213_v25 = vpop.eup %3212 }
 0x7ef   : > { %v3215_v40 = vpop.eup %3214  ;;  %3023 = vmatprep.mubr.msk.f32.mxu1 %vm684_vm4, %v3213_v25  ;;  %v4185_v25 = vld [vmem:[#allocation22_spill] sm:$0xff] }
 0x7f0   : > { %3024 = vmatmul.mubr.msk.f32.gmra.mxu1 %vm684_vm4, %v3215_v40  ;;  %v4186_v40 = vld [vmem:[#allocation24_spill] sm:$0xff] }
 0x7f1   : > { %3034 = vmatprep.mubr.msk.f32.mxu1 %vm3288_vm0, %v4167_v62 }
 0x8ac   : > { %v3022_v23 = vpop.f32.mrf.mxu1 }
 0x8ad   : > { %v1846_v19 = vadd.f32 %v3022_v23, %v3472_v47  ;;  %v4187_v23 = vld [vmem:[#allocation23_spill] sm:$0xff] }
 0x8ae   : > { %v1840_v42 = vpop.f32.mrf.mxu1 }
 0x8af   : > { %v1841_v0 = vadd.f32 %v1840_v42, %v3472_v47  ;;  %v2699_v43 = vmul.f32 -1.442695, %v1846_v19  ;;  %v4188_v19 = vld [vmem:[#allocation25_spill] sm:$0xff]  ;;  %v4189_v42 = vld [vmem:[#allocation27_spill] sm:$0xff] }
 0x8b0   : > { %v3025_v27 = vpop.f32.mrf.mxu1 }
 0x8b1   : > { %v1856_v3 = vadd.f32 %v3025_v27, %v3472_v47  ;;  %v2698_v39 = vmul.f32 -1.442695, %v1841_v0  ;;  %3216 = vpow2.f32 %v2699_v43  ;;  %v4190_v0 = vld [vmem:[#allocation26_spill] sm:$0xff]  ;;  %v4191_v43 = vld [vmem:[#allocation28_spill] sm:$0xff] }
 0x8b2   : > { %v1850_v14 = vpop.f32.mrf.mxu1  ;;  %v4192_v27 = vld [vmem:[#allocation30_spill] sm:$0xff] }
 0x8b3   : > { %v2701_v15 = vmul.f32 -1.442695, %v1856_v3  ;;  %v1851_v26 = vadd.f32 %v1850_v14, %v3472_v47  ;;  %v4193_v3 = vld [vmem:[#allocation29_spill] sm:$0xff] }
 0x8b4   : > { %v4195_v14 = vld [vmem:[#allocation33_spill] sm:$0xff] }
 0x8b5   : > { %3218 = vpow2.f32 %v2701_v15  ;;  %v2700_v41 = vmul.f32 -1.442695, %v1851_v26  ;;  %v4196_v15 = vld [vmem:[#allocation32_spill] sm:$0xff]  ;;  %v4197_v26 = vld [vmem:[#allocation34_spill] sm:$0xff] }
 0x8b6   : > { %3220 = vpow2.f32 %v2698_v39  ;;  %v4194_v39 = vld [vmem:[#allocation31_spill] sm:$0xff] }
 0x8b7   : > { %3222 = vpow2.f32 %v2700_v41  ;;  %v4198_v41 = vld [vmem:[#allocation36_spill] sm:$0xff] }
 0x8be   : > { %v3217_v2 = vpop.eup %3216 }
 0x8bf   : > { %v1872_v44 = vadd.f32 1.0, %v3217_v2  ;;  %v4199_v2 = vld [vmem:[#allocation35_spill] sm:$0xff] }
 0x8c2   : > { %v3219_v4 = vpop.eup %3218 }
 0x8c3   : > { %v3221_v9 = vpop.eup %3220  ;;  %v1874_v10 = vadd.f32 1.0, %v3219_v4  ;;  %v4200_v4 = vld [vmem:[#allocation37_spill] sm:$0xff] }
 0x8c4   : > { %v3223_v11 = vpop.eup %3222  ;;  %v1871_v46 = vadd.f32 1.0, %v3221_v9  ;;  %v4201_v9 = vld [vmem:[#allocation39_spill] sm:$0xff] }
 0x8c5   : > { %3224 = vrcp.f32 %v1874_v10  ;;  %v1873_v45 = vadd.f32 1.0, %v3223_v11  ;;  %v4202_v10 = vld [vmem:[#allocation38_spill] sm:$0xff]  ;;  %v4203_v11 = vld [vmem:[#allocation40_spill] sm:$0xff] }
 0x8c7   : > { %3226 = vrcp.f32 %v1873_v45  ;;  %v4205_v45 = vld [vmem:[#allocation41_spill] sm:$0xff] }
 0x8c8   : > { %3228 = vrcp.f32 %v1872_v44  ;;  %v4204_v44 = vld [vmem:[#allocation42_spill] sm:$0xff] }
 0x8c9   : > { %3230 = vrcp.f32 %v1871_v46  ;;  %v4206_v46 = vld [vmem:[#allocation43_spill] sm:$0xff] }
 0x8d2   : > { %v3225_v49 = vpop.eup %3224 }
 0x8d3   : > { %3027 = vmatpush3.msra.mxu1 %v3225_v49  ;;  %v4207_v49 = vld [vmem:[#allocation44_spill] sm:$0xff] }
 0x8d4   : > { %v3227_v47 = vpop.eup %3226  ;;  %3028 = vmatprep.subr.mxu1 %v4167_v62 }
 0x8d5   : > { %3029 = vmatpush3.msra.mxu1 %v3227_v47  ;;  %v3229_v7 = vpop.eup %3228  ;;  %v4208_v47 = vld [vmem:[#allocation45_spill] sm:$0xff] }
 0x8d6   : > { %3030 = vmatprep.subr.mxu1 %v4167_v62  ;;  %v3231_v24 = vpop.eup %3230 }
 0x8d7   : > { %3031 = vmatpush3.msra.mxu1 %v3229_v7  ;;  %v4209_v7 = vld [vmem:[#allocation46_spill] sm:$0xff] }
 0x8d8   : > { %3032 = vmatprep.subr.mxu1 %v4167_v62 }
 0x8d9   : > { %3033 = vmatpush3.msra.mxu1 %v3231_v24  ;;  %v4210_v24 = vld [vmem:[#allocation47_spill] sm:$0xff] }
 0x8da   : > { %3035 = vmatmul.mubr.msk.f32.vlgmr.msra.gmra.mxu1 %vm684_vm4, %v3483_v22  ;;  %2706 = vmatprep.subr.msk.mxu1 %vm415_vm1, %v3494_v28 }
 0x8db   : > { %2707 = vmatpush1.msk.msra.mxu1 %vm415_vm1, %v3496_v29  ;;  %2096 = vmatprep.mubr.f32.mxu1 %v4167_v62 }
 0x8dc   : > { %3048 = vmatprep.subr.mxu1 %v4167_v62 }
 0x8de   : > { %2708 = vmatmul.mubr.msk.f32.vlgmr.msra.gmra.mxu1 %vm411_vm2, %v3831_v13 }
 0x8df   : > { %3049 = vmatpush3.msk.msra.mxu1 %vm415_vm1, %v3500_v30  ;;  %3050 = vmatprep.mubr.msk.f32.mxu1 %vm3288_vm0, %v4167_v62 }
 0x8e0   : > { %3053 = vmatprep.subr.mxu1 %v4167_v62 }
 0x8e2   : > { %3051 = vmatmul.mubr.msk.f32.vlgmr.msra.gmra.mxu1 %vm411_vm2, %v3831_v13 }
 0x8e3   : > { %3054 = vmatpush3.msk.msra.mxu1 %vm1117_vm7, %v3524_v35  ;;  %3057 = vmatprep.mubr.msk.f32.mxu1 %vm3288_vm0, %v4167_v62 }
 0x8e4   : > { %3055 = vmatprep.subr.mxu1 %v4167_v62 }
 0x8e5   : > { %3056 = vmatpush3.msra.mxu1 %v3532_v37 }
 0x8e6   : > { %3060 = vmatprep.subr.mxu1 %v4167_v62 }
 0x99a   : > { %v1949_v22 = vpop.f32.mrf.mxu1 }
 0x99b   : > { %3046 = vmatmul.mubr.msk.f32.vlgmr.msra.gmra.mxu0 %vm879_vm6, %v1949_v22  ;;  %v4211_v22 = vld [vmem:[#allocation48_spill] sm:$0xff] }
 0x99c   : > { %v3036_v28 = vpop.f32.mrf.mxu1  ;;  %2712 = vmatpush1.msk.msra.mxu0 %vm1117_vm7, %v3508_v32  ;;  %2240 = vmatprep.mubr.f32.mxu0 %v4167_v62 }
 0x99d   : > { %2206 = vmatprep.subr.mxu0 %v3513_v33  ;;  %v4212_v28 = vld [vmem:[#allocation49_spill] sm:$0xff] }
 0x99e   : > { %v3908_v29 = vpop.f32.mrf.mxu1  ;;  %2207 = vmatpush1.msra.mxu0 %v3519_v34  ;;  %v4168_v34 = vld [vmem:[#allocation6_spill] sm:$0xff] }
 0x99f   : > { %2320 = vmatprep.subr.mxu0 %v3527_v36  ;;  %v4169_v36 = vld [vmem:[#allocation5_spill] sm:$0xff] }
 0x9a0   : > { %v3912_v30 = vpop.f32.mrf.mxu1 }
 0x9a2   : > { %v3914_v35 = vpop.f32.mrf.mxu1 }
 0x9a4   : > { %v3052_v37 = vpop.f32.mrf.mxu1 }
 0x9a5   : > { %v4213_v37 = vld [vmem:[#allocation50_spill] sm:$0xff] }
 0xa5b   : > { %v2022_v13 = vpop.f32.mrf.mxu0 }
 0xa5c   : > { %v2023_v6 = vadd.f32 %v2022_v13, %v3542_v38  ;;  %v4170_v38 = vld [vmem:[#allocation7_spill] sm:$0xff] }
 0xa5d   : > { %v3047_v31 = vpop.f32.mrf.mxu0  ;;  %v4214_v13 = vld [vmem:[#allocation51_spill] sm:$0xff] }
 0xa5e   : > { %v2705_v32 = vmul.f32 -1.442695, %v2023_v6  ;;  %v4215_v6 = vld [vmem:[#allocation52_spill] sm:$0xff]  ;;  %v4216_v31 = vld [vmem:[#allocation53_spill] sm:$0xff] }
 0xa60   : > { %3232 = vpow2.f32 %v2705_v32  ;;  %v4217_v32 = vld [vmem:[#allocation54_spill] sm:$0xff] }
 0xa6d   : > { %v3233_v60 = vpop.eup %3232 }
 0xa6e   : > { %v2029_v16 = vadd.f32 1.0, %v3233_v60  ;;  %v4218_v60 = vld [vmem:[#allocation55_spill] sm:$0xff] }
 0xa70   : > { %3234 = vrcp.f32 %v2029_v16  ;;  %v4219_v16 = vld [vmem:[#allocation56_spill] sm:$0xff] }
 0xa7d   : > { %v3235_v33 = vpop.eup %3234 }
 0xa7e   : > { %2713 = vmatmul.mubr.msk.f32.vlgmr.msra.gmra.mxu0 %vm1113_vm8, %v3235_v33  ;;  %3058 = vmatmul.mubr.msk.f32.vlgmr.msra.gmra.mxu1 %vm1113_vm8, %v3235_v33  ;;  %v4220_v33 = vld [vmem:[#allocation57_spill] sm:$0xff] }
 0xa7f   : > { %2321 = vmatpush1.msra.mxu0 %v3545_v48  ;;  %3061 = vmatpush3.msra.mxu1 %v3549_v51  ;;  %v4171_v48 = vld [vmem:[#allocation9_spill] sm:$0xff]  ;;  %v4173_v51 = vld [vmem:[#allocation10_spill] sm:$0xff] }
 0xa80   : > { %2322 = vmatprep.subr.mxu0 %v3547_v50  ;;  %3062 = vmatprep.subr.mxu1 %v4167_v62  ;;  %v4172_v50 = vld [vmem:[#allocation8_spill] sm:$0xff] }
 0xa81   : > { %2323 = vmatpush1.msra.mxu0 %v3553_v52  ;;  %3063 = vmatpush3.msra.mxu1 %v3559_v54  ;;  %v4174_v52 = vld [vmem:[#allocation12_spill] sm:$0xff]  ;;  %v4176_v54 = vld [vmem:[#allocation13_spill] sm:$0xff] }
 0xa82   : > { %2324 = vmatprep.subr.mxu0 %v3556_v53  ;;  %3064 = vmatprep.subr.mxu1 %v4167_v62  ;;  %v4175_v53 = vld [vmem:[#allocation11_spill] sm:$0xff] }
 0xa83   : > { %2325 = vmatpush1.msra.mxu0 %v3562_v55  ;;  %3065 = vmatpush3.msra.mxu1 %v4168_v34  ;;  %v4177_v55 = vld [vmem:[#allocation15_spill] sm:$0xff]  ;;  %v4221_v34 = vld [vmem:[#allocation58_spill] sm:$0xff] }
 0xa84   : > { %2326 = vmatprep.subr.mxu0 %v4169_v36  ;;  %3066 = vmatprep.subr.mxu1 %v4167_v62  ;;  %v4222_v36 = vld [vmem:[#allocation59_spill] sm:$0xff] }
 0xa85   : > { %2327 = vmatpush1.msra.mxu0 %v4170_v38  ;;  %3067 = vmatpush3.msra.mxu1 %v4171_v48  ;;  %v4223_v38 = vld [vmem:[#allocation60_spill] sm:$0xff] }
 0xa86   : > { %2328 = vmatprep.subr.mxu0 %v4172_v50  ;;  %3068 = vmatprep.subr.mxu1 %v4167_v62 }
 0xa87   : > { %2329 = vmatpush1.msra.mxu0 %v4173_v51  ;;  %3069 = vmatpush3.msra.mxu1 %v4174_v52 }
 0xa88   : > { %2330 = vmatprep.subr.mxu0 %v4175_v53  ;;  %3070 = vmatprep.subr.mxu1 %v4167_v62 }
 0xa89   : > { %2331 = vmatpush1.msra.mxu0 %v4176_v54  ;;  %3071 = vmatpush3.msra.mxu1 %v4177_v55 }
 0xa8a   : > { %2332 = vmatprep.subr.mxu0 %v4178_v59  ;;  %3072 = vmatprep.subr.mxu1 %v4167_v62  ;;  %v4224_v59 = vld [vmem:[#allocation61_spill] sm:$0xff] }
 0xa8b   : > { %2333 = vmatpush1.msra.mxu0 %v4179_v5  ;;  %3073 = vmatpush3.msra.mxu1 %v4180_v18  ;;  %v4225_v18 = vld [vmem:[#allocation62_spill] sm:$0xff] }
 0xa8c   : > { %2334 = vmatprep.subr.mxu0 %v4181_v8  ;;  %3074 = vmatprep.subr.mxu1 %v4167_v62 }
 0xa8d   : > { %2335 = vmatpush1.msra.mxu0 %v4182_v61  ;;  %3075 = vmatpush3.msra.mxu1 %v4183_v21 }
 0xa8e   : > { %2336 = vmatprep.subr.mxu0 %v4184_v58  ;;  %3076 = vmatprep.subr.mxu1 %v4167_v62 }
 0xa8f   : > { %2337 = vmatpush1.msra.mxu0 %v4185_v25  ;;  %3077 = vmatpush3.msra.mxu1 %v4186_v40 }
 0xa90   : > { %2338 = vmatprep.subr.mxu0 %v4187_v23  ;;  %3078 = vmatprep.subr.mxu1 %v4167_v62 }
 0xa91   : > { %2339 = vmatpush1.msra.mxu0 %v4188_v19  ;;  %3079 = vmatpush3.msra.mxu1 %v4189_v42 }
 0xa92   : > { %2340 = vmatprep.subr.mxu0 %v4190_v0  ;;  %3080 = vmatprep.subr.mxu1 %v4167_v62 }
 0xa93   : > { %2341 = vmatpush1.msra.mxu0 %v4191_v43  ;;  %3081 = vmatpush3.msra.mxu1 %v4192_v27 }
 0xa94   : > { %2342 = vmatprep.subr.mxu0 %v4193_v3  ;;  %3082 = vmatprep.subr.mxu1 %v4167_v62 }
 0xa95   : > { %2343 = vmatpush1.msra.mxu0 %v4194_v39  ;;  %3083 = vmatpush3.msra.mxu1 %v4195_v14 }
 0xa96   : > { %2344 = vmatprep.subr.mxu0 %v4196_v15  ;;  %3084 = vmatprep.subr.mxu1 %v4167_v62 }
 0xa97   : > { %2345 = vmatpush1.msra.mxu0 %v4197_v26  ;;  %3085 = vmatpush3.msra.mxu1 %v4198_v41 }
 0xa98   : > { %2346 = vmatprep.subr.mxu0 %v4199_v2  ;;  %3086 = vmatprep.subr.mxu1 %v4167_v62 }
 0xa99   : > { %2347 = vmatpush1.msra.mxu0 %v4200_v4  ;;  %3087 = vmatpush3.msra.mxu1 %v4201_v9 }
 0xa9a   : > { %2348 = vmatprep.subr.mxu0 %v4202_v10  ;;  %3088 = vmatprep.subr.mxu1 %v4167_v62 }
 0xa9b   : > { %2349 = vmatpush1.msra.mxu0 %v4203_v11  ;;  %3089 = vmatpush3.msra.mxu1 %v4204_v44 }
 0xa9c   : > { %2350 = vmatprep.subr.mxu0 %v4205_v45  ;;  %3090 = vmatprep.subr.mxu1 %v4167_v62 }
 0xa9d   : > { %2351 = vmatpush1.msra.mxu0 %v4206_v46  ;;  %2384 = vmatprep.mubr.f32.mxu0 %v4167_v62 }
 0xa9e   : > { %3091 = vmatpush3.msra.mxu1 %v4207_v49  ;;  %3092 = vmatprep.mubr.msk.f32.mxu1 %vm3288_vm0, %v4167_v62 }
 0xa9f   : > { %2385 = vmatmul.mubr.f32.vlgmr.msra.gmra.mxu0 %v3813_v20  ;;  %3093 = vmatmul.mubr.f32.vlgmr.msra.gmra.mxu1 %v3813_v20 }
 0xaa0   : > { %3095 = vmatprep.subr.mxu0 %v4167_v62  ;;  %3127 = vmatprep.mubr.msk.f32.mxu0 %vm3288_vm0, %v4167_v62 }
 0xaa1   : > { %3096 = vmatpush3.msra.mxu0 %v4208_v47 }
 0xaa2   : > { %3097 = vmatprep.subr.mxu0 %v4167_v62 }
 0xaa3   : > { %3098 = vmatpush3.msra.mxu0 %v4209_v7 }
 0xaa4   : > { %3099 = vmatprep.subr.mxu0 %v4167_v62 }
 0xaa5   : > { %3100 = vmatpush3.msra.mxu0 %v4210_v24 }
 0xaa6   : > { %3101 = vmatprep.subr.mxu0 %v4167_v62 }
 0xaa7   : > { %3102 = vmatpush3.msra.mxu0 %v4211_v22 }
 0xaa8   : > { %3103 = vmatprep.subr.mxu0 %v4167_v62 }
 0xaa9   : > { %3104 = vmatpush3.msra.mxu0 %v4212_v28 }
 0xaaa   : > { %3105 = vmatprep.subr.mxu0 %v4167_v62 }
 0xaab   : > { %3106 = vmatpush3.msra.mxu0 %v4213_v37 }
 0xaac   : > { %3107 = vmatprep.subr.mxu0 %v4167_v62 }
 0xaad   : > { %3108 = vmatpush3.msra.mxu0 %v4214_v13 }
 0xaae   : > { %3109 = vmatprep.subr.mxu0 %v4167_v62 }
 0xaaf   : > { %3110 = vmatpush3.msra.mxu0 %v4215_v6 }
 0xab0   : > { %3111 = vmatprep.subr.mxu0 %v4167_v62 }
 0xab1   : > { %3112 = vmatpush3.msra.mxu0 %v4216_v31 }
 0xab2   : > { %3113 = vmatprep.subr.mxu0 %v4167_v62 }
 0xab3   : > { %3114 = vmatpush3.msra.mxu0 %v4217_v32 }
 0xab4   : > { %3115 = vmatprep.subr.mxu0 %v4167_v62 }
 0xab5   : > { %3116 = vmatpush3.msra.mxu0 %v4218_v60 }
 0xab6   : > { %3117 = vmatprep.subr.mxu0 %v4167_v62 }
 0xab7   : > { %3118 = vmatpush3.msra.mxu0 %v4219_v16 }
 0xab8   : > { %3119 = vmatprep.subr.mxu0 %v4167_v62 }
 0xab9   : > { %3120 = vmatpush3.msra.mxu0 %v4220_v33 }
 0xaba   : > { %3121 = vmatprep.subr.mxu0 %v4167_v62 }
 0xabb   : > { %3122 = vmatpush3.msra.mxu0 %v4221_v34 }
 0xabc   : > { %3123 = vmatprep.subr.mxu0 %v4167_v62 }
 0xabd   : > { %3124 = vmatpush3.msra.mxu0 %v4222_v36 }
 0xabe   : > { %3125 = vmatprep.subr.mxu0 %v4167_v62 }
 0xabf   : > { %3126 = vmatpush3.msra.mxu0 %v4223_v38 }
 0xb3e   : > { %v2313_v48 = vpop.f32.mrf.mxu1  ;;  %v2242_v51 = vpop.f32.mrf.mxu0 }
 0xb3f   : > { %v2243_v52 = vadd.f32 %v2242_v51, %v3908_v29  ;;  %v2314_v27 = vadd.f32 %v2313_v48, %v3914_v35 }
 0xb40   : > { %v3059_v50 = vpop.f32.mrf.mxu1  ;;  %v2244_v53 = vpop.f32.mrf.mxu0 }
 0xb41   : > { %v2317_v5 = vadd.f32 %v2243_v52, %v4224_v59  ;;  %v2245_v58 = vadd.f32 %v2244_v53, %v3912_v30  ;;  %v2319_v14 = vadd.f32 %v2314_v27, %v3808_v57 }
 0xb43   : > { %v2318_v23 = vadd.f32 %v2245_v58, %v3801_v63 }
 0xb5f   : > { %v2386_v54 = vpop.f32.mrf.mxu0  ;;  %v2457_v55 = vpop.f32.mrf.mxu1 }
 0xb60   : > { %v2387_v8 = vadd.f32 %v2386_v54, %v4225_v18  ;;  %v2458_v39 = vadd.f32 %v2457_v55, %v3806_v56 }
 0xb61   : > { %v2388_v61 = vpop.f32.mrf.mxu0  ;;  %v3094_v21 = vpop.f32.mrf.mxu1 }
 0xb62   : > { %v2461_v25 = vadd.f32 %v2387_v8, %v2317_v5  ;;  %v2389_v40 = vadd.f32 %v2388_v61, %v3799_v1 }
 0xb64   : > { %v2716_v62 = vmul.f32 -1.442695, %v2461_v25  ;;  %v2468_v19 = vadd.f32 %v2389_v40, %v2318_v23 }
 0xb66   : > { %3236 = vpow2.f32 %v2716_v62  ;;  %v2717_v29 = vmul.f32 -1.442695, %v2468_v19 }
 0xb68   : > { %3238 = vpow2.f32 %v2717_v29 }
 0xb73   : > { %v3237_v42 = vpop.eup %3236 }
 0xb74   : > { %v2465_v0 = vadd.f32 1.0, %v3237_v42 }
 0xb75   : > { %v3239_v43 = vpop.eup %3238 }
 0xb76   : > { %3240 = vrcp.f32 %v2465_v0  ;;  %v2472_v3 = vadd.f32 1.0, %v3239_v43 }
 0xb78   : > { %3242 = vrcp.f32 %v2472_v3 }
 0xb83   : > { %v3241_v30 = vpop.eup %3240 }
 0xb84   : > { %v2475_v1 = vmul.f32 %v3241_v30, %v2458_v39 }
 0xb85   : > { %v3243_v15 = vpop.eup %3242 }
 0xb86   : > { %v2476_v63 = vadd.f32 %v2475_v1, %v2319_v14  ;;  %v2478_v26 = vsub.f32 1.0, %v3243_v15  ;;  %v2480_v4 = vmul.f32 %v3243_v15, %v3813_v20 }
 0xb88   : > { %3244 = vtanh.f32 %v2476_v63 }
 0xb95   : > { %v3245_v41 = vpop.eup %3244 }
 0xb96   : > { %v2479_v2 = vmul.f32 %v3245_v41, %v2478_v26 }
 0xb98   : > { %v2481_v9 = vadd.f32 %v2480_v4, %v2479_v2 }
 0xb9a   : > { %3128 = vmatmul.mubr.f32.vlgmr.msra.gmra.mxu0 %v2481_v9 }
 0xc5a   : > { %v2548_v35 = vpop.f32.mrf.mxu0 }
 0xc5b   : > { %v2549_v10 = vadd.f32 %v2548_v35, %v3824_v17 }
 0xc5c   : > { %v3129_v56 = vpop.f32.mrf.mxu0 }
 0xc5d   : > { %2553 = vrot.lane.b32.xlu0 %v2549_v10, %s3289_s10 }
 0xccf   : > { %v2554_v57 = vpop.permute.xlu0 %2553 }
 0xcd0   : > { %v2556_v11 = vsel %vm1508_vm9, %v3827_v12, %v2554_v57 }
 0xcd1   : > { %2558 = vst.msk [vmem:[%s278_s13] sm:$0xff] %vm2557_vm10, %v2556_v11 }
 0xcd2 PF: > { %s17_s21 = sadd.s32 1, %s3282_s21  }
 0xcd3   : > { %p14_p1 = scmp.ge.s32.totalorder %s17_s21, 4  }
 0xcd5   :  { %16 = sbr.rel (!%p14_p1) target bundleno = 1 (0x1), region = 84 }
 0xcda   :  { %2578 = vsyncpa [#allocation3], 1 }
 0xcdb   :  { %2580 = vsyncpa [#allocation3 + $0x1], 1 }

</bundles_post_ra>
